<compile_context>
chip_gen: v6e
topology: v6e:2x2x1
jax: 0.10.0
libtpu: 0.0.40
codegen_flags: <defaults>
</compile_context>

<pallas_src>
import functools

import jax
import jax.numpy as jnp
from jax import lax
from jax.experimental import pallas as pl
from jax.experimental.pallas import tpu as pltpu


def _round_up(x, m):
    return ((x + m - 1) // m) * m


def _vq_kernel(x_ref, w_ref, esq_ref,
               q_ref, enc_ref, counts_ref, sse_ref,
               *, batch, block_rows, mask_rows, clean_x, bf16_scores):
    # x_ref:      (TB, Dp)  input rows for this batch tile
    # w_ref:      (Kp, Dp)  codebook, VMEM-resident (constant index map); used for BOTH
    #                       matmuls — the distance matmul contracts on D directly so no
    #                       transposed second copy is shipped.
    # esq_ref:    (1,  Kp)  ||e_j||^2 (padded codes hold +1e30)
    # q_ref:      (TB, Dp)  quantized rows (out)
    # enc_ref:    (TB, Kp)  one-hot encodings, stored as int8 (out)
    # counts_ref: (1,  Kp)  per-tile code-usage partial sums (out)
    # sse_ref:    (1,  Dp)  per-tile squared-error partial sums (out)
    i = pl.program_id(0)

    x = x_ref[...]                                                        # (TB, Dp) f32
    if mask_rows:
        row = lax.broadcasted_iota(jnp.int32, (block_rows, 1), 0) + i * block_rows
        valid_b = row < batch                                             # (TB, 1) bool
        valid = valid_b.astype(jnp.float32)
        if clean_x:
            # Ragged last tile may read uninitialized VMEM rows; zero them so no
            # NaN/Inf can leak into the matmuls or the SSE accumulation.
            x = jnp.where(valid_b, x, 0.0)

    w = w_ref[...]                                                        # (Kp, Dp)
    if bf16_scores:
        xs, ws = x.astype(jnp.bfloat16), w.astype(jnp.bfloat16)
    else:
        xs, ws = x, w

    # scores differ from the true distances only by the per-row constant ||x||^2,
    # which cannot change the argmin.  Contract on D of both operands (x @ E^T)
    # without materializing a transposed codebook copy.
    xet = lax.dot_general(xs, ws, dimension_numbers=(((1,), (1,)), ((), ())),
                          preferred_element_type=jnp.float32)             # (TB, Kp)
    scores = esq_ref[...] - 2.0 * xet

    # First-index argmin along the lane (codebook) axis.
    kp = scores.shape[1]
    col = lax.broadcasted_iota(jnp.int32, scores.shape, 1)                # (TB, Kp)
    min_s = jnp.min(scores, axis=1, keepdims=True)                        # (TB, 1)
    idx = jnp.min(jnp.where(scores == min_s, col, kp), axis=1, keepdims=True)
    enc = (col == idx).astype(jnp.float32)                                # (TB, Kp) one-hot

    # Selection matmul stays f32 so quantized values match the codebook exactly.
    quant = jnp.dot(enc, w, preferred_element_type=jnp.float32)           # (TB, Dp)

    q_ref[...] = quant.astype(q_ref.dtype)
    enc_ref[...] = enc.astype(enc_ref.dtype)          # int8 store: 4x less HBM traffic

    if mask_rows:
        enc_v = enc * valid
        diff = (quant - x) * valid
    else:
        enc_v = enc
        diff = quant - x
    counts_ref[...] = jnp.sum(enc_v, axis=0, keepdims=True)               # (1, Kp)
    sse_ref[...] = jnp.sum(diff * diff, axis=0, keepdims=True)            # (1, Dp)


def vector_quantizer(inputs, embedding_weight, commitment_cost, *,
                     block_rows=512, bf16_scores=False, encodings_dtype=jnp.float32):
    """Pallas TPU forward of VectorQuantizer.

    inputs:           [B, D] float (flattened latents)
    embedding_weight: [K, D] float (nn.Embedding weight)
    returns: (loss, quantized [B, D], perplexity, encodings [B, K])
    """
    inputs = inputs.astype(jnp.float32)
    weight = embedding_weight.astype(jnp.float32)
    B, D = inputs.shape
    K, D_w = weight.shape
    assert D == D_w

    Dp = _round_up(D, 128)
    Kp = _round_up(K, 128)

    # Batch tile: large by default (amortizes per-step overhead and the per-step
    # codebook push into the MXU), bounded so the (tb, Kp) f32 score tile stays
    # ~<= 8 MiB (v7x VMEM is 64 MiB physical), rounded to 32 rows so the int8
    # encodings tile stays natively packed.
    tb = min(int(block_rows), max(64, (8 << 20) // (4 * Kp)))
    tb = min(tb, _round_up(B, 32))
    tb = max(32, _round_up(tb, 32))
    nb = (B + tb - 1) // tb
    Bp = nb * tb

    pad_cols = Dp != D
    if pad_cols:
        # Column padding requires a copy anyway; pad the rows in the same pass.
        x_in = jnp.zeros((Bp, Dp), jnp.float32).at[:B, :D].set(inputs)
        out_rows = Bp
        clean_x = False
    else:
        # D already lane-aligned: feed inputs directly (no padded HBM round trip);
        # the ragged last tile is handled by the in-kernel row mask.
        x_in = inputs
        out_rows = B
        clean_x = Bp != B
    mask_rows = Bp != B

    if (Kp, Dp) == (K, D):
        w_pad = weight
    else:
        w_pad = jnp.zeros((Kp, Dp), jnp.float32).at[:K, :D].set(weight)
    # ||e_j||^2 once; padded codebook rows get a huge value so argmin never picks them.
    esq = jnp.sum(weight * weight, axis=1)
    if Kp == K:
        esq_pad = esq[None, :]
    else:
        esq_pad = jnp.full((1, Kp), 1e30, jnp.float32).at[0, :K].set(esq)

    kernel = functools.partial(_vq_kernel, batch=B, block_rows=tb,
                               mask_rows=mask_rows, clean_x=clean_x,
                               bf16_scores=bf16_scores)

    flops = 4 * Bp * Kp * Dp                                    # two MXU passes
    bytes_accessed = (4 * Bp * Dp                               # x in
                      + 4 * Kp * (Dp + 1)                       # codebook + ||e||^2
                      + 4 * out_rows * Dp                       # quantized out
                      + out_rows * Kp                           # int8 encodings out
                      + 4 * nb * (Kp + Dp))                     # per-tile partials

    # VMEM budget (double-buffered tiles + resident codebook + intermediate headroom).
    # Note: v7x physical VMEM is 64 MiB; the tile bound above keeps realistic
    # codebooks inside that ceiling with a single codebook copy.
    vmem_limit = (2 * 4 * tb * Dp * 2            # x in + q out, double-buffered
                  + 2 * (4 * Kp * Dp + 4 * Kp)   # codebook + esq buffers
                  + 2 * tb * Kp                  # int8 enc out, double-buffered
                  + 6 * 4 * tb * Kp              # scores / one-hot intermediates
                  + (1 << 20))
    vmem_limit = int(min(max(vmem_limit, 32 << 20), 112 << 20))

    q_out, enc_out, counts, sse = pl.pallas_call(
        kernel,
        out_shape=(
            jax.ShapeDtypeStruct((out_rows, Dp), jnp.float32),   # quantized
            jax.ShapeDtypeStruct((out_rows, Kp), jnp.int8),      # one-hot encodings
            jax.ShapeDtypeStruct((nb, 1, Kp), jnp.float32),      # per-tile code counts
            jax.ShapeDtypeStruct((nb, 1, Dp), jnp.float32),      # per-tile squared error
        ),
        grid_spec=pl.GridSpec(
            grid=(nb,),
            in_specs=[
                pl.BlockSpec((tb, Dp), lambda i: (i, 0)),    # inputs tile
                pl.BlockSpec((Kp, Dp), lambda i: (0, 0)),    # codebook (resident, 1 copy)
                pl.BlockSpec((1, Kp), lambda i: (0, 0)),     # ||e||^2 (resident)
            ],
            out_specs=(
                pl.BlockSpec((tb, Dp), lambda i: (i, 0)),
                pl.BlockSpec((tb, Kp), lambda i: (i, 0)),
                pl.BlockSpec((None, 1, Kp), lambda i: (i, 0, 0)),
                pl.BlockSpec((None, 1, Dp), lambda i: (i, 0, 0)),
            ),
        ),
        compiler_params=pltpu.CompilerParams(
            # All outputs are per-tile (no carried accumulator), so the batch-tile
            # axis is truly parallel -> shards across both TensorCores on v7x.
            dimension_semantics=("parallel",),
            vmem_limit_bytes=vmem_limit,
        ),
        cost_estimate=pl.CostEstimate(
            flops=flops, transcendentals=0, bytes_accessed=bytes_accessed),
    )(x_in, w_pad, esq_pad)

    quantized = q_out if (out_rows == B and Dp == D) else q_out[:B, :D]
    enc_i8 = enc_out if (out_rows == B and Kp == K) else enc_out[:B, :K]
    encodings = enc_i8.astype(encodings_dtype)

    counts_k = jnp.sum(counts, axis=(0, 1))[:K]                 # (K,)
    mse = jnp.sum(sse) / (B * D)                 # == F.mse_loss(quantized, inputs)
    # .detach() only changes gradients; both MSE terms share the same forward value.
    loss = mse + commitment_cost * mse
    avg_probs = counts_k / B
    perplexity = jnp.exp(-jnp.sum(avg_probs * jnp.log(avg_probs + 1e-10)))
    # Straight-through estimator: forward value is just `quantized`.
    return loss, quantized, perplexity, encodings


if __name__ == "__main__":
    B, D, K = 200, 32, 64          # batch of flattened latents, embedding_dim, num_embeddings
    commitment_cost = 0.25

    key = jax.random.PRNGKey(0)
    k_x, k_w = jax.random.split(key)
    # nn.Embedding init in the module: uniform(-1/K, 1/K).
    weight = jax.random.uniform(k_w, (K, D), jnp.float32, minval=-1.0 / K, maxval=1.0 / K)
    inputs = jax.random.normal(k_x, (B, D), jnp.float32) * (1.0 / K)

    loss, quantized, perplexity, encodings = jax.block_until_ready(
        vector_quantizer(inputs, weight, commitment_cost))

    # Pure-JAX reference (float32 stand-in for the torch.double forward).
    d = (jnp.sum(inputs ** 2, axis=1, keepdims=True)
         + jnp.sum(weight ** 2, axis=1)
         - 2.0 * inputs @ weight.T)
    idx_ref = jnp.argmin(d, axis=1)
    enc_ref = jax.nn.one_hot(idx_ref, K, dtype=jnp.float32)
    quant_ref = enc_ref @ weight
    mse_ref = jnp.mean((quant_ref - inputs) ** 2)
    loss_ref = mse_ref + commitment_cost * mse_ref
    avg_ref = jnp.mean(enc_ref, axis=0)
    perp_ref = jnp.exp(-jnp.sum(avg_ref * jnp.log(avg_ref + 1e-10)))

    assert quantized.shape == (B, D) and encodings.shape == (B, K)
    assert jnp.array_equal(encodings, enc_ref)
    assert jnp.allclose(quantized, quant_ref, atol=1e-5, rtol=1e-5)
    assert jnp.allclose(loss, loss_ref, atol=1e-6, rtol=1e-4)
    assert jnp.allclose(perplexity, perp_ref, atol=1e-4, rtol=1e-4)

    print("KERNEL_OK")
</pallas_src>

<mosaic_0001>
module attributes {stable_mosaic.version = 11 : i64} {
  func.func @_vq_kernel(%arg0: i32, %arg1: memref<224x128xf32, #tpu.memory_space<vmem>>, %arg2: memref<128x128xf32, #tpu.memory_space<vmem>>, %arg3: memref<1x128xf32, #tpu.memory_space<vmem>>, %arg4: memref<224x128xf32, #tpu.memory_space<vmem>>, %arg5: memref<224x128xi8, #tpu.memory_space<vmem>>, %arg6: memref<1x1x128xf32, #tpu.memory_space<vmem>>, %arg7: memref<1x1x128xf32, #tpu.memory_space<vmem>>) attributes {dimension_semantics = [#tpu.dimension_semantics<parallel>], iteration_bounds = array<i64: 1>, scalar_prefetch = 0 : i64, scratch_operands = 0 : i64, tpu.core_type = #tpu.core_type<tc>, window_params = [{transform_indices = @transform_0, window_bounds = array<i64: 224, 128>}, {pipeline_mode = #tpu.pipeline_mode<synchronous>, transform_indices = @transform_1, window_bounds = array<i64: 128, 128>}, {pipeline_mode = #tpu.pipeline_mode<synchronous>, transform_indices = @transform_2, window_bounds = array<i64: 1, 128>}, {transform_indices = @transform_3, window_bounds = array<i64: 224, 128>}, {transform_indices = @transform_4, window_bounds = array<i64: 224, 128>}, {transform_indices = @transform_5, window_bounds = array<i64: 1, 1, 128>}, {transform_indices = @transform_6, window_bounds = array<i64: 1, 1, 128>}]} {
    %c0 = arith.constant 0 : index
    %c0_0 = arith.constant 0 : index
    %0 = vector.load %arg1[%c0, %c0_0] : memref<224x128xf32, #tpu.memory_space<vmem>>, vector<224x128xf32>
    %1 = tpu.iota {dimensions = array<i32: 0>} : vector<224x1xi32>
    %c224_i32 = arith.constant 224 : i32
    %2 = arith.muli %arg0, %c224_i32 : i32
    %3 = vector.broadcast %2 : i32 to vector<224x1xi32>
    %4 = arith.addi %1, %3 : vector<224x1xi32>
    %c200_i32 = arith.constant 200 : i32
    %5 = vector.broadcast %c200_i32 : i32 to vector<224x1xi32>
    %6 = arith.cmpi slt, %4, %5 : vector<224x1xi32>
    %7 = arith.extui %6 : vector<224x1xi1> to vector<224x1xi32>
    %8 = arith.sitofp %7 : vector<224x1xi32> to vector<224x1xf32>
    %c0_1 = arith.constant 0 : index
    %c0_2 = arith.constant 0 : index
    %9 = vector.load %arg2[%c0_1, %c0_2] : memref<128x128xf32, #tpu.memory_space<vmem>>, vector<128x128xf32>
    %cst = arith.constant dense<0.000000e+00> : vector<224x128xf32>
    %10 = tpu.matmul %0, %9, %cst {dimension_numbers = #tpu.dot_dimension_numbers<[1], [1], [0], [0], [0, 0, 1, 0], [], []>} : vector<224x128xf32>, vector<128x128xf32>, vector<224x128xf32> -> vector<224x128xf32>
    %c0_3 = arith.constant 0 : index
    %c0_4 = arith.constant 0 : index
    %11 = vector.load %arg3[%c0_3, %c0_4] : memref<1x128xf32, #tpu.memory_space<vmem>>, vector<1x128xf32>
    %cst_5 = arith.constant 2.000000e+00 : f32
    %12 = vector.broadcast %cst_5 : f32 to vector<224x128xf32>
    %13 = arith.mulf %12, %10 : vector<224x128xf32>
    %14 = vector.broadcast %11 : vector<1x128xf32> to vector<224x128xf32>
    %15 = arith.subf %14, %13 : vector<224x128xf32>
    %16 = tpu.iota {dimensions = array<i32: 1>} : vector<224x128xi32>
    %cst_6 = arith.constant dense<0x7F800000> : vector<224xf32>
    %17 = vector.multi_reduction <minimumf>, %15, %cst_6 [1] : vector<224x128xf32> to vector<224xf32>
    %18 = vector.shape_cast %17 : vector<224xf32> to vector<224x1xf32>
    %19 = vector.broadcast %18 : vector<224x1xf32> to vector<224x128xf32>
    %20 = arith.cmpf oeq, %15, %19 : vector<224x128xf32>
    %c128_i32 = arith.constant 128 : i32
    %21 = vector.broadcast %c128_i32 : i32 to vector<224x128xi32>
    %22 = arith.select %20, %16, %21 : vector<224x128xi1>, vector<224x128xi32>
    %cst_7 = arith.constant dense<2147483647> : vector<224xi32>
    %23 = vector.multi_reduction <minsi>, %22, %cst_7 [1] : vector<224x128xi32> to vector<224xi32>
    %24 = vector.shape_cast %23 : vector<224xi32> to vector<224x1xi32>
    %25 = vector.broadcast %24 : vector<224x1xi32> to vector<224x128xi32>
    %26 = arith.cmpi eq, %16, %25 : vector<224x128xi32>
    %27 = arith.extui %26 : vector<224x128xi1> to vector<224x128xi32>
    %28 = arith.sitofp %27 : vector<224x128xi32> to vector<224x128xf32>
    %cst_8 = arith.constant dense<0.000000e+00> : vector<224x128xf32>
    %29 = tpu.matmul %28, %9, %cst_8 {dimension_numbers = #tpu.dot_dimension_numbers<[1], [0], [0], [1], [0, 0, 1, 1], [], []>} : vector<224x128xf32>, vector<128x128xf32>, vector<224x128xf32> -> vector<224x128xf32>
    %c0_9 = arith.constant 0 : index
    %c0_10 = arith.constant 0 : index
    %30 = vector.load %arg4[%c0_9, %c0_10] : memref<224x128xf32, #tpu.memory_space<vmem>>, vector<224x128xf32>
    tpu.vector_store %arg4[%c0_9, %c0_10], %29 {strides = array<i32>} : memref<224x128xf32, #tpu.memory_space<vmem>>, vector<224x128xf32>,
    %31 = arith.fptosi %28 : vector<224x128xf32> to vector<224x128xi8>
    %c0_11 = arith.constant 0 : index
    %c0_12 = arith.constant 0 : index
    %32 = vector.load %arg5[%c0_11, %c0_12] : memref<224x128xi8, #tpu.memory_space<vmem>>, vector<224x128xi8>
    tpu.vector_store %arg5[%c0_11, %c0_12], %31 {strides = array<i32>} : memref<224x128xi8, #tpu.memory_space<vmem>>, vector<224x128xi8>,
    %33 = vector.broadcast %8 : vector<224x1xf32> to vector<224x128xf32>
    %34 = arith.mulf %28, %33 : vector<224x128xf32>
    %35 = arith.subf %29, %0 : vector<224x128xf32>
    %36 = vector.broadcast %8 : vector<224x1xf32> to vector<224x128xf32>
    %37 = arith.mulf %35, %36 : vector<224x128xf32>
    %cst_13 = arith.constant dense<0.000000e+00> : vector<128xf32>
    %38 = vector.multi_reduction <add>, %34, %cst_13 [0] : vector<224x128xf32> to vector<128xf32>
    %39 = vector.shape_cast %38 : vector<128xf32> to vector<1x128xf32>
    %c0_14 = arith.constant 0 : index
    %c0_15 = arith.constant 0 : index
    %c0_16 = arith.constant 0 : index
    %40 = vector.load %arg6[%c0_14, %c0_15, %c0_16] : memref<1x1x128xf32, #tpu.memory_space<vmem>>, vector<1x1x128xf32>
    %41 = vector.shape_cast %40 : vector<1x1x128xf32> to vector<1x128xf32>
    %42 = vector.shape_cast %39 : vector<1x128xf32> to vector<1x1x128xf32>
    tpu.vector_store %arg6[%c0_14, %c0_15, %c0_16], %42 {strides = array<i32>} : memref<1x1x128xf32, #tpu.memory_space<vmem>>, vector<1x1x128xf32>,
    %43 = arith.mulf %37, %37 : vector<224x128xf32>
    %cst_17 = arith.constant dense<0.000000e+00> : vector<128xf32>
    %44 = vector.multi_reduction <add>, %43, %cst_17 [0] : vector<224x128xf32> to vector<128xf32>
    %45 = vector.shape_cast %44 : vector<128xf32> to vector<1x128xf32>
    %c0_18 = arith.constant 0 : index
    %c0_19 = arith.constant 0 : index
    %c0_20 = arith.constant 0 : index
    %46 = vector.load %arg7[%c0_18, %c0_19, %c0_20] : memref<1x1x128xf32, #tpu.memory_space<vmem>>, vector<1x1x128xf32>
    %47 = vector.shape_cast %46 : vector<1x1x128xf32> to vector<1x128xf32>
    %48 = vector.shape_cast %45 : vector<1x128xf32> to vector<1x1x128xf32>
    tpu.vector_store %arg7[%c0_18, %c0_19, %c0_20], %48 {strides = array<i32>} : memref<1x1x128xf32, #tpu.memory_space<vmem>>, vector<1x1x128xf32>,
    return
  }
  func.func @transform_0(%arg0: i32) -> (i32, i32) {
    %c0_i32 = arith.constant 0 : i32
    %c0_i32_0 = arith.constant 0 : i32
    return %arg0, %c0_i32 : i32, i32
  }
  func.func @transform_1(%arg0: i32) -> (i32, i32) {
    %c0_i32 = arith.constant 0 : i32
    %c0_i32_0 = arith.constant 0 : i32
    %c0_i32_1 = arith.constant 0 : i32
    return %c0_i32, %c0_i32_0 : i32, i32
  }
  func.func @transform_2(%arg0: i32) -> (i32, i32) {
    %c0_i32 = arith.constant 0 : i32
    %c0_i32_0 = arith.constant 0 : i32
    %c0_i32_1 = arith.constant 0 : i32
    return %c0_i32, %c0_i32_0 : i32, i32
  }
  func.func @transform_3(%arg0: i32) -> (i32, i32) {
    %c0_i32 = arith.constant 0 : i32
    %c0_i32_0 = arith.constant 0 : i32
    return %arg0, %c0_i32 : i32, i32
  }
  func.func @transform_4(%arg0: i32) -> (i32, i32) {
    %c0_i32 = arith.constant 0 : i32
    %c0_i32_0 = arith.constant 0 : i32
    return %arg0, %c0_i32 : i32, i32
  }
  func.func @transform_5(%arg0: i32) -> (i32, i32, i32) {
    %c0_i32 = arith.constant 0 : i32
    %c0_i32_0 = arith.constant 0 : i32
    %c0_i32_1 = arith.constant 0 : i32
    return %arg0, %c0_i32, %c0_i32_0 : i32, i32, i32
  }
  func.func @transform_6(%arg0: i32) -> (i32, i32, i32) {
    %c0_i32 = arith.constant 0 : i32
    %c0_i32_0 = arith.constant 0 : i32
    %c0_i32_1 = arith.constant 0 : i32
    return %arg0, %c0_i32, %c0_i32_0 : i32, i32, i32
  }
}

</mosaic_0001>

<bundles_post_ra>
// kernel: tpu_custom_call.1
= control target key start
LH: loop header
LB: loop body
LE: loop exit
PB: predicated region body
PF: predicated region fallthrough
CT: control target
= control target key end

     0   :  { %12 = vsyncpa [#allocation3], 0  ;;  %s2948_s0 = inlined_call_operand.hbm [shape: f32[224,128], index: 0, kind: input, shape index: {}]   ;;  %s2949_s1 = inlined_call_operand.hbm [shape: f32[128,128], index: 1, kind: input, shape index: {}]   ;;  %s2950_s2 = inlined_call_operand.vmem [shape: f32[1,128], index: 2, kind: input, shape index: {}]   ;;  %s2951_s3 = inlined_call_operand.hbm [shape: f32[224,128], index: 3, kind: output, shape index: {0}]   ;;  %s2952_s4 = inlined_call_operand.hbm [shape: s8[224,128], index: 4, kind: output, shape index: {1}]   ;;  %s2953_s5 = inlined_call_operand.hbm [shape: f32[1,1,128], index: 5, kind: output, shape index: {2}]   ;;  %s2954_s6 = inlined_call_operand.hbm [shape: f32[1,1,128], index: 6, kind: output, shape index: {3}]  }
   0x1   :  { %13 = vsyncpa [#allocation6], 0 }
   0x2   :  { %14 = vsyncpa [#allocation4], 0 }
   0x3   :  { %15 = vsyncpa [#allocation9], 0 }
   0x4   :  { %16 = vsyncpa [#allocation12], 0  ;;  %s2197_s21 = smov [#allocation2]  }
   0x5   :  { %s22_s22 = sshll.u32 %s2197_s21, 4  ;;  %s23_s22 = int_to_ptr.vmem [resolvable:$true] %s22_s22 }
   0x6   :  { %s2075_s23 = scalar_lea.vmem %s23_s22, 3584  ;;  %p2080_p1 = scmp.lt.s32.totalorder %s23_s22, %s23_s22 }
   0x7   :  { %p2076_p0 = scmp.ne.s32.totalorder %s23_s22, %s2075_s23  ;;  %p2081_p2 = scmp.lt.s32.totalorder %s2075_s23, %s2075_s23 }
   0x9   :  { %p2082_p3 = por %p2081_p2, %p2080_p1 }
   0xb   :  { %p2083_p4 = pnand %p2082_p3, %p2076_p0 }
   0xd   :  { %2086 = shalt.err (!%p2083_p4)
}
   0xe   :  { %s2198_s24 = smov 128   ;;  %s2199_s25 = smov 8  }
   0xf   :  { %28 = dma.hbm_to_vmem [thread:$0]  %s2948_s0, 3584, %s23_s22, [#allocation3], %s2198_s24, %s2198_s24, %s2199_s25  }
  0x10   :  { %s2200_s28 = smov [#allocation5]  }
  0x11   :  { %s34_s29 = sshll.u32 %s2200_s28, 4  ;;  %s35_s29 = int_to_ptr.vmem [resolvable:$true] %s34_s29 }
  0x12   :  { %s2095_s30 = scalar_lea.vmem %s35_s29, 2048  ;;  %p2100_p6 = scmp.lt.s32.totalorder %s35_s29, %s35_s29 }
  0x13   :  { %p2096_p5 = scmp.ne.s32.totalorder %s35_s29, %s2095_s30  ;;  %p2101_p7 = scmp.lt.s32.totalorder %s2095_s30, %s2095_s30 }
  0x15   :  { %p2102_p8 = por %p2101_p7, %p2100_p6 }
  0x17   :  { %p2103_p9 = pnand %p2102_p8, %p2096_p5 }
  0x19   :  { %2106 = shalt.err (!%p2103_p9)
}
  0x1a   :  { %40 = dma.hbm_to_vmem [thread:$0]  %s2949_s1, 2048, %s35_s29, [#allocation6], %s2198_s24, %s2198_s24, %s2199_s25  }
  0x1b   :  { %2187 = dma.done.wait [#allocation3], 3584  }
  0x1c   :  { %2188 = vsyncadd [#allocation3], 4294963712 }
  0x1d   :  { %2189 = dma.done.wait [#allocation6], 2048  }
  0x1e   :  { %2190 = vsyncadd [#allocation6], 4294965248  ;;  %v235_v0 = vld [vmem:[#allocation5 + $0x78] sm:$0xff]  ;;  %v234_v1 = vld [vmem:[#allocation5 + $0x70] sm:$0xff] }
  0x1f   :  { %1825 = vmatprep.subr.mxu0 %v235_v0  ;;  %1899 = vmatprep.subr.mxu1 %v235_v0  ;;  %v233_v2 = vld [vmem:[#allocation5 + $0x68] sm:$0xff]  ;;  %v49_v3 = vld [vmem:[#allocation2] sm:$0xff]  ;;  %v231_v5 = vld [vmem:[#allocation5 + $0x58] sm:$0xff] }
  0x20   :  { %1826 = vmatpush3.xpose.msra.mxu0 %v235_v0  ;;  %1900 = vmatpush3.msra.mxu1 %v235_v0  ;;  %v232_v4 = vld [vmem:[#allocation5 + $0x60] sm:$0xff]  ;;  %v230_v6 = vld [vmem:[#allocation5 + $0x50] sm:$0xff]  ;;  %v229_v7 = vld [vmem:[#allocation5 + $0x48] sm:$0xff] }
  0x21   :  { %1827 = vmatprep.subr.mxu0 %v234_v1  ;;  %1901 = vmatprep.subr.mxu1 %v234_v1  ;;  %v228_v8 = vld [vmem:[#allocation5 + $0x40] sm:$0xff]  ;;  %v227_v9 = vld [vmem:[#allocation5 + $0x38] sm:$0xff]  ;;  %v226_v10 = vld [vmem:[#allocation5 + $0x30] sm:$0xff] }
  0x22   :  { %1902 = vmatpush3.msra.mxu1 %v234_v1  ;;  %1857 = vmatprep.mubr.f32.mxu0 %v49_v3  ;;  %v225_v11 = vld [vmem:[#allocation5 + $0x28] sm:$0xff]  ;;  %v224_v12 = vld [vmem:[#allocation5 + $0x20] sm:$0xff]  ;;  %v223_v13 = vld [vmem:[#allocation5 + $0x18] sm:$0xff] }
  0x23   :  { %1903 = vmatprep.subr.mxu1 %v233_v2  ;;  %v222_v14 = vld [vmem:[#allocation5 + $0x10] sm:$0xff]  ;;  %v221_v15 = vld [vmem:[#allocation5 + $0x8] sm:$0xff]  ;;  %v220_v16 = vld [vmem:[#allocation5] sm:$0xff] }
  0x24   :  { %1828 = vmatpush3.xpose.msra.mxu0 %v234_v1  ;;  %1904 = vmatpush3.msra.mxu1 %v233_v2  ;;  %v50_v17 = vld [vmem:[#allocation2 + $0x8] sm:$0xff]  ;;  %v51_v18 = vld [vmem:[#allocation2 + $0x10] sm:$0xff]  ;;  %v52_v19 = vld [vmem:[#allocation2 + $0x18] sm:$0xff] }
  0x25   :  { %1829 = vmatprep.subr.mxu0 %v233_v2  ;;  %1905 = vmatprep.subr.mxu1 %v232_v4  ;;  %v53_v20 = vld [vmem:[#allocation2 + $0x20] sm:$0xff]  ;;  %v54_v21 = vld [vmem:[#allocation2 + $0x28] sm:$0xff]  ;;  %v55_v22 = vld [vmem:[#allocation2 + $0x30] sm:$0xff] }
  0x26   :  { %1906 = vmatpush3.msra.mxu1 %v232_v4  ;;  %v56_v23 = vld [vmem:[#allocation2 + $0x38] sm:$0xff]  ;;  %v57_v24 = vld [vmem:[#allocation2 + $0x40] sm:$0xff]  ;;  %v58_v25 = vld [vmem:[#allocation2 + $0x48] sm:$0xff] }
  0x27   :  { %1907 = vmatprep.subr.mxu1 %v231_v5  ;;  %v59_v26 = vld [vmem:[#allocation2 + $0x50] sm:$0xff]  ;;  %v60_v27 = vld [vmem:[#allocation2 + $0x58] sm:$0xff]  ;;  %v61_v28 = vld [vmem:[#allocation2 + $0x60] sm:$0xff] }
  0x28   :  { %1830 = vmatpush3.xpose.msra.mxu0 %v233_v2  ;;  %1908 = vmatpush3.msra.mxu1 %v231_v5  ;;  %v62_v29 = vld [vmem:[#allocation2 + $0x68] sm:$0xff]  ;;  %v63_v30 = vld [vmem:[#allocation2 + $0x70] sm:$0xff]  ;;  %v64_v31 = vld [vmem:[#allocation2 + $0x78] sm:$0xff] }
  0x29   :  { %1831 = vmatprep.subr.mxu0 %v232_v4  ;;  %1909 = vmatprep.subr.mxu1 %v230_v6  ;;  %v65_v32 = vld [vmem:[#allocation2 + $0x80] sm:$0xff]  ;;  %v66_v33 = vld [vmem:[#allocation2 + $0x88] sm:$0xff]  ;;  %v67_v34 = vld [vmem:[#allocation2 + $0x90] sm:$0xff] }
  0x2a   :  { %1910 = vmatpush3.msra.mxu1 %v230_v6  ;;  %v68_v35 = vld [vmem:[#allocation2 + $0x98] sm:$0xff]  ;;  %v69_v36 = vld [vmem:[#allocation2 + $0xa0] sm:$0xff]  ;;  %v70_v37 = vld [vmem:[#allocation2 + $0xa8] sm:$0xff] }
  0x2b   :  { %1911 = vmatprep.subr.mxu1 %v229_v7  ;;  %v71_v38 = vld [vmem:[#allocation2 + $0xb0] sm:$0xff]  ;;  %v72_v39 = vld [vmem:[#allocation2 + $0xb8] sm:$0xff]  ;;  %v73_v40 = vld [vmem:[#allocation2 + $0xc0] sm:$0xff] }
  0x2c   :  { %1832 = vmatpush3.xpose.msra.mxu0 %v232_v4  ;;  %1912 = vmatpush3.msra.mxu1 %v229_v7  ;;  %v74_v41 = vld [vmem:[#allocation2 + $0xc8] sm:$0xff]  ;;  %v75_v42 = vld [vmem:[#allocation2 + $0xd0] sm:$0xff]  ;;  %v76_v43 = vld [vmem:[#allocation2 + $0xd8] sm:$0xff] }
  0x2d   :  { %1833 = vmatprep.subr.mxu0 %v231_v5  ;;  %1913 = vmatprep.subr.mxu1 %v228_v8  ;;  %v2257_v48 = vld [vmem:[%s2950_s2] ss:$0 sm:$0xff]  ;;  %s2203_s2 = smov [#allocation8]  }
  0x2e   :  { %1914 = vmatpush3.msra.mxu1 %v228_v8  ;;  %s1636_s9 = sshll.u32 %s2203_s2, 4  ;;  %s1637_s9 = int_to_ptr.vmem [resolvable:$true] %s1636_s9 }
  0x2f   :  { %1915 = vmatprep.subr.mxu1 %v227_v9  ;;  %s2107_s10 = scalar_lea.vmem %s1637_s9, 896  ;;  %p2112_p11 = scmp.lt.s32.totalorder %s1637_s9, %s1637_s9 }
  0x30   :  { %1834 = vmatpush3.xpose.msra.mxu0 %v231_v5  ;;  %1916 = vmatpush3.msra.mxu1 %v227_v9  ;;  %p2108_p10 = scmp.ne.s32.totalorder %s1637_s9, %s2107_s10  ;;  %p2113_p12 = scmp.lt.s32.totalorder %s2107_s10, %s2107_s10 }
  0x31   :  { %1835 = vmatprep.subr.mxu0 %v230_v6  ;;  %1917 = vmatprep.subr.mxu1 %v226_v10 }
  0x32   :  { %1918 = vmatpush3.msra.mxu1 %v226_v10  ;;  %p2114_p13 = por %p2113_p12, %p2112_p11 }
  0x33   :  { %1919 = vmatprep.subr.mxu1 %v225_v11 }
  0x34   :  { %1836 = vmatpush3.xpose.msra.mxu0 %v230_v6  ;;  %1920 = vmatpush3.msra.mxu1 %v225_v11  ;;  %p2115_p0 = pnand %p2114_p13, %p2108_p10 }
  0x35   :  { %1837 = vmatprep.subr.mxu0 %v229_v7  ;;  %1921 = vmatprep.subr.mxu1 %v224_v12 }
  0x36   :  { %1922 = vmatpush3.msra.mxu1 %v224_v12 }
  0x37   :  { %1923 = vmatprep.subr.mxu1 %v223_v13 }
  0x38   :  { %1838 = vmatpush3.xpose.msra.mxu0 %v229_v7  ;;  %1924 = vmatpush3.msra.mxu1 %v223_v13 }
  0x39   :  { %1839 = vmatprep.subr.mxu0 %v228_v8  ;;  %1925 = vmatprep.subr.mxu1 %v222_v14 }
  0x3a   :  { %1926 = vmatpush3.msra.mxu1 %v222_v14 }
  0x3b   :  { %1927 = vmatprep.subr.mxu1 %v221_v15 }
  0x3c   :  { %1840 = vmatpush3.xpose.msra.mxu0 %v228_v8  ;;  %1928 = vmatpush3.msra.mxu1 %v221_v15 }
  0x3d   :  { %1841 = vmatprep.subr.mxu0 %v227_v9  ;;  %1929 = vmatprep.subr.mxu1 %v220_v16 }
  0x3e   :  { %1930 = vmatpush3.msra.mxu1 %v220_v16 }
  0x40   :  { %1842 = vmatpush3.xpose.msra.mxu0 %v227_v9 }
  0x41   :  { %1843 = vmatprep.subr.mxu0 %v226_v10 }
  0x44   :  { %1844 = vmatpush3.xpose.msra.mxu0 %v226_v10 }
  0x45   :  { %1845 = vmatprep.subr.mxu0 %v225_v11 }
  0x48   :  { %1846 = vmatpush3.xpose.msra.mxu0 %v225_v11 }
  0x49   :  { %1847 = vmatprep.subr.mxu0 %v224_v12 }
  0x4c   :  { %1848 = vmatpush3.xpose.msra.mxu0 %v224_v12 }
  0x4d   :  { %1849 = vmatprep.subr.mxu0 %v223_v13 }
  0x50   :  { %1850 = vmatpush3.xpose.msra.mxu0 %v223_v13 }
  0x51   :  { %1851 = vmatprep.subr.mxu0 %v222_v14 }
  0x54   :  { %1852 = vmatpush3.xpose.msra.mxu0 %v222_v14 }
  0x55   :  { %1853 = vmatprep.subr.mxu0 %v221_v15 }
  0x58   :  { %1854 = vmatpush3.xpose.msra.mxu0 %v221_v15 }
  0x59   :  { %1855 = vmatprep.subr.mxu0 %v220_v16 }
  0x5c   :  { %1856 = vmatpush3.xpose.msra.mxu0 %v220_v16 }
  0x5f   :  { %1858 = vmatmul.mubr.f32.vlgmr.msra.gmra.mxu0 %v50_v17 }
  0x60   :  { %1860 = vmatprep.mubr.f32.mxu0 %v51_v18 }
  0x63   :  { %1861 = vmatmul.mubr.f32.gmra.mxu0 %v52_v19 }
  0x64   :  { %1863 = vmatprep.mubr.f32.mxu0 %v53_v20 }
  0x67   :  { %1864 = vmatmul.mubr.f32.gmra.mxu0 %v54_v21 }
  0x68   :  { %1866 = vmatprep.mubr.f32.mxu0 %v55_v22 }
  0x6b   :  { %1867 = vmatmul.mubr.f32.gmra.mxu0 %v56_v23 }
  0x6c   :  { %1869 = vmatprep.mubr.f32.mxu0 %v57_v24 }
  0x6f   :  { %1870 = vmatmul.mubr.f32.gmra.mxu0 %v58_v25 }
  0x70   :  { %1872 = vmatprep.mubr.f32.mxu0 %v59_v26 }
  0x73   :  { %1873 = vmatmul.mubr.f32.gmra.mxu0 %v60_v27 }
  0x74   :  { %1875 = vmatprep.mubr.f32.mxu0 %v61_v28 }
  0x77   :  { %1876 = vmatmul.mubr.f32.gmra.mxu0 %v62_v29 }
  0x78   :  { %1878 = vmatprep.mubr.f32.mxu0 %v63_v30 }
  0x7b   :  { %1879 = vmatmul.mubr.f32.gmra.mxu0 %v64_v31 }
  0x7c   :  { %1881 = vmatprep.mubr.f32.mxu0 %v65_v32 }
  0x7f   :  { %1882 = vmatmul.mubr.f32.gmra.mxu0 %v66_v33 }
  0x80   :  { %1884 = vmatprep.mubr.f32.mxu0 %v67_v34 }
  0x83   :  { %1885 = vmatmul.mubr.f32.gmra.mxu0 %v68_v35 }
  0x84   :  { %1887 = vmatprep.mubr.f32.mxu0 %v69_v36 }
  0x87   :  { %1888 = vmatmul.mubr.f32.gmra.mxu0 %v70_v37 }
  0x88   :  { %1890 = vmatprep.mubr.f32.mxu0 %v71_v38 }
  0x8b   :  { %1891 = vmatmul.mubr.f32.gmra.mxu0 %v72_v39 }
  0x8c   :  { %1893 = vmatprep.mubr.f32.mxu0 %v73_v40 }
  0x8f   :  { %1894 = vmatmul.mubr.f32.gmra.mxu0 %v74_v41 }
  0x90   :  { %1896 = vmatprep.mubr.f32.mxu0 %v75_v42 }
  0x93   :  { %1897 = vmatmul.mubr.f32.gmra.mxu0 %v76_v43 }
 0x11f   :  { %v1859_v44 = vpop.f32.mrf.mxu0 }
 0x120   :  { %v443_v49 = vmul.f32 2.0, %v1859_v44 }
 0x121   :  { %v302_v45 = vpop.f32.mrf.mxu0 }
 0x122   :  { %v442_v46 = vmul.f32 2.0, %v302_v45  ;;  %v2264_v55 = vsub.f32 %v2257_v48, %v443_v49 }
 0x123   :  { %v1862_v47 = vpop.f32.mrf.mxu0 }
 0x124   :  { %v2260_v50 = vsub.f32 %v2257_v48, %v442_v46  ;;  %v445_v54 = vmul.f32 2.0, %v1862_v47 }
 0x125   :  { %v312_v51 = vpop.f32.mrf.mxu0 }
 0x126   :  { %v444_v52 = vmul.f32 2.0, %v312_v51  ;;  %506 = vmin.xlane.f32.xlu0 %v2260_v50  ;;  %v2272_v61 = vsub.f32 %v2257_v48, %v445_v54 }
 0x127   :  { %v1865_v53 = vpop.f32.mrf.mxu0 }
 0x128   :  { %v2267_v56 = vsub.f32 %v2257_v48, %v444_v52  ;;  %v447_v60 = vmul.f32 2.0, %v1865_v53 }
 0x129   :  { %v322_v57 = vpop.f32.mrf.mxu0 }
 0x12a   :  { %v446_v58 = vmul.f32 2.0, %v322_v57  ;;  %508 = vmin.xlane.f32.xlu0 %v2264_v55  ;;  %510 = vmin.xlane.f32.xlu1 %v2267_v56  ;;  %v2280_v3 = vsub.f32 %v2257_v48, %v447_v60 }
 0x12b   :  { %v1868_v59 = vpop.f32.mrf.mxu0 }
 0x12c   :  { %v2275_v62 = vsub.f32 %v2257_v48, %v446_v58  ;;  %v449_v2 = vmul.f32 2.0, %v1868_v59 }
 0x12d   :  { %v332_v63 = vpop.f32.mrf.mxu0 }
 0x12e   :  { %v448_v0 = vmul.f32 2.0, %v332_v63  ;;  %512 = vmin.xlane.f32.xlu1 %v2272_v61  ;;  %514 = vmin.xlane.f32.xlu0 %v2275_v62  ;;  %v2288_v9 = vsub.f32 %v2257_v48, %v449_v2 }
 0x12f   :  { %v1871_v1 = vpop.f32.mrf.mxu0 }
 0x130   :  { %v2283_v4 = vsub.f32 %v2257_v48, %v448_v0  ;;  %v451_v8 = vmul.f32 2.0, %v1871_v1 }
 0x131   :  { %v342_v5 = vpop.f32.mrf.mxu0 }
 0x132   :  { %v450_v6 = vmul.f32 2.0, %v342_v5  ;;  %516 = vmin.xlane.f32.xlu1 %v2280_v3  ;;  %518 = vmin.xlane.f32.xlu0 %v2283_v4  ;;  %v2296_v15 = vsub.f32 %v2257_v48, %v451_v8 }
 0x133   :  { %v1874_v7 = vpop.f32.mrf.mxu0 }
 0x134   :  { %v2291_v10 = vsub.f32 %v2257_v48, %v450_v6  ;;  %v453_v14 = vmul.f32 2.0, %v1874_v7 }
 0x135   :  { %v352_v11 = vpop.f32.mrf.mxu0 }
 0x136   :  { %v452_v12 = vmul.f32 2.0, %v352_v11  ;;  %520 = vmin.xlane.f32.xlu1 %v2288_v9  ;;  %522 = vmin.xlane.f32.xlu0 %v2291_v10  ;;  %v2304_v21 = vsub.f32 %v2257_v48, %v453_v14  ;;  %v504_v11 = vlaneseq }
 0x137   :  { %v1877_v13 = vpop.f32.mrf.mxu0 }
 0x138   :  { %v2299_v16 = vsub.f32 %v2257_v48, %v452_v12  ;;  %v455_v20 = vmul.f32 2.0, %v1877_v13  ;;  %v2371_v12 = vand.u32 127, %v504_v11 }
 0x139   :  { %v362_v17 = vpop.f32.mrf.mxu0 }
 0x13a   :  { %v454_v18 = vmul.f32 2.0, %v362_v17  ;;  %524 = vmin.xlane.f32.xlu1 %v2296_v15  ;;  %526 = vmin.xlane.f32.xlu0 %v2299_v16  ;;  %v2312_v27 = vsub.f32 %v2257_v48, %v455_v20  ;;  %2959 = vst [vmem:[#allocation18_spill] sm:$0xff] %v2371_v12 }
 0x13b   :  { %v1880_v19 = vpop.f32.mrf.mxu0 }
 0x13c   :  { %v2307_v22 = vsub.f32 %v2257_v48, %v454_v18  ;;  %v457_v26 = vmul.f32 2.0, %v1880_v19 }
 0x13d   :  { %v372_v23 = vpop.f32.mrf.mxu0 }
 0x13e   :  { %v456_v24 = vmul.f32 2.0, %v372_v23  ;;  %528 = vmin.xlane.f32.xlu1 %v2304_v21  ;;  %530 = vmin.xlane.f32.xlu0 %v2307_v22  ;;  %v2320_v33 = vsub.f32 %v2257_v48, %v457_v26 }
 0x13f   :  { %v1883_v25 = vpop.f32.mrf.mxu0 }
 0x140   :  { %v2315_v28 = vsub.f32 %v2257_v48, %v456_v24  ;;  %v459_v32 = vmul.f32 2.0, %v1883_v25 }
 0x141   :  { %v382_v29 = vpop.f32.mrf.mxu0 }
 0x142   :  { %v458_v30 = vmul.f32 2.0, %v382_v29  ;;  %532 = vmin.xlane.f32.xlu1 %v2312_v27  ;;  %534 = vmin.xlane.f32.xlu0 %v2315_v28  ;;  %v2328_v39 = vsub.f32 %v2257_v48, %v459_v32 }
 0x143   :  { %v1886_v31 = vpop.f32.mrf.mxu0 }
 0x144   :  { %v2323_v34 = vsub.f32 %v2257_v48, %v458_v30  ;;  %v461_v38 = vmul.f32 2.0, %v1886_v31 }
 0x145   :  { %v392_v35 = vpop.f32.mrf.mxu0 }
 0x146   :  { %v460_v36 = vmul.f32 2.0, %v392_v35  ;;  %536 = vmin.xlane.f32.xlu1 %v2320_v33  ;;  %538 = vmin.xlane.f32.xlu0 %v2323_v34  ;;  %v2336_v45 = vsub.f32 %v2257_v48, %v461_v38 }
 0x147   :  { %v1889_v37 = vpop.f32.mrf.mxu0 }
 0x148   :  { %v2331_v40 = vsub.f32 %v2257_v48, %v460_v36  ;;  %v463_v44 = vmul.f32 2.0, %v1889_v37 }
 0x149   :  { %v402_v41 = vpop.f32.mrf.mxu0 }
 0x14a   :  { %v462_v42 = vmul.f32 2.0, %v402_v41  ;;  %540 = vmin.xlane.f32.xlu1 %v2328_v39  ;;  %542 = vmin.xlane.f32.xlu0 %v2331_v40  ;;  %v2344_v53 = vsub.f32 %v2257_v48, %v463_v44 }
 0x14b   :  { %v1892_v43 = vpop.f32.mrf.mxu0 }
 0x14c   :  { %v2339_v46 = vsub.f32 %v2257_v48, %v462_v42  ;;  %v465_v52 = vmul.f32 2.0, %v1892_v43 }
 0x14d   :  { %v412_v47 = vpop.f32.mrf.mxu0 }
 0x14e   :  { %v464_v49 = vmul.f32 2.0, %v412_v47  ;;  %544 = vmin.xlane.f32.xlu1 %v2336_v45  ;;  %546 = vmin.xlane.f32.xlu0 %v2339_v46  ;;  %v2352_v63 = vsub.f32 %v2257_v48, %v465_v52 }
 0x14f   :  { %v1895_v51 = vpop.f32.mrf.mxu0 }
 0x150   :  { %v2347_v54 = vsub.f32 %v2257_v48, %v464_v49  ;;  %v467_v60 = vmul.f32 2.0, %v1895_v51 }
 0x151   :  { %v422_v57 = vpop.f32.mrf.mxu0 }
 0x152   :  { %v466_v58 = vmul.f32 2.0, %v422_v57  ;;  %548 = vmin.xlane.f32.xlu1 %v2344_v53  ;;  %550 = vmin.xlane.f32.xlu0 %v2347_v54  ;;  %v2360_v6 = vsub.f32 %v2257_v48, %v467_v60 }
 0x153   :  { %v1898_v59 = vpop.f32.mrf.mxu0 }
 0x154   :  { %v2355_v0 = vsub.f32 %v2257_v48, %v466_v58  ;;  %v469_v5 = vmul.f32 2.0, %v1898_v59 }
 0x155   :  { %v432_v1 = vpop.f32.mrf.mxu0 }
 0x156   :  { %v468_v2 = vmul.f32 2.0, %v432_v1  ;;  %552 = vmin.xlane.f32.xlu1 %v2352_v63  ;;  %554 = vmin.xlane.f32.xlu0 %v2355_v0  ;;  %v2368_v8 = vsub.f32 %v2257_v48, %v469_v5 }
 0x158   :  { %v2363_v7 = vsub.f32 %v2257_v48, %v468_v2 }
 0x15a   :  { %556 = vmin.xlane.f32.xlu1 %v2360_v6  ;;  %558 = vmin.xlane.f32.xlu0 %v2363_v7 }
 0x15e   :  { %560 = vmin.xlane.f32.xlu1 %v2368_v8 }
 0x1af   :  { %v507_v13 = vpop.xlane.xlu0 %506 }
 0x1b0   :  { %vm562_vm0 = vcmp.eq.f32.partialorder %v2260_v50, %v507_v13 }
 0x1b1   :  { %v2375_v14 = vsel %vm562_vm0, %v2371_v12, 128 }
 0x1b2   :  { %v619_v17 = vshra.s32 %v2375_v14, 16 }
 0x1b3   :  { %v509_v18 = vpop.xlane.xlu0 %508  ;;  %v511_v19 = vpop.xlane.xlu1 %510 }
 0x1b4   :  { %vm563_vm1 = vcmp.eq.f32.partialorder %v2264_v55, %v509_v18  ;;  %vm564_vm2 = vcmp.eq.f32.partialorder %v2267_v56, %v511_v19  ;;  %v2380_v48 = vcvt.s32.f32 %v619_v17 }
 0x1b5   :  { %v2383_v20 = vsel %vm563_vm1, %v2371_v12, 128  ;;  %v2386_v23 = vsel %vm564_vm2, %v2371_v12, 128 }
 0x1b6   :  { %622 = vmin.xlane.f32.xlu0 %v2380_v48  ;;  %v633_v50 = vshra.s32 %v2383_v20, 16  ;;  %v647_v24 = vshra.s32 %v2386_v23, 16 }
 0x1b7   :  { %v513_v25 = vpop.xlane.xlu1 %512  ;;  %v515_v26 = vpop.xlane.xlu0 %514 }
 0x1b8   :  { %vm565_vm3 = vcmp.eq.f32.partialorder %v2272_v61, %v513_v25  ;;  %vm566_vm4 = vcmp.eq.f32.partialorder %v2275_v62, %v515_v26  ;;  %v2393_v55 = vcvt.s32.f32 %v633_v50  ;;  %v2395_v56 = vcvt.s32.f32 %v647_v24 }
 0x1b9   :  { %v2398_v29 = vsel %vm565_vm3, %v2371_v12, 128  ;;  %v2401_v30 = vsel %vm566_vm4, %v2371_v12, 128 }
 0x1ba   :  { %636 = vmin.xlane.f32.xlu1 %v2393_v55  ;;  %650 = vmin.xlane.f32.xlu0 %v2395_v56  ;;  %v661_v31 = vshra.s32 %v2398_v29, 16  ;;  %v675_v61 = vshra.s32 %v2401_v30, 16 }
 0x1bb   :  { %v517_v32 = vpop.xlane.xlu1 %516  ;;  %v519_v62 = vpop.xlane.xlu0 %518 }
 0x1bc   :  { %vm567_vm5 = vcmp.eq.f32.partialorder %v2280_v3, %v517_v32  ;;  %vm568_vm6 = vcmp.eq.f32.partialorder %v2283_v4, %v519_v62  ;;  %v2409_v35 = vcvt.s32.f32 %v661_v31  ;;  %v2411_v36 = vcvt.s32.f32 %v675_v61 }
 0x1bd   :  { %v2414_v37 = vsel %vm567_vm5, %v2371_v12, 128  ;;  %v2417_v38 = vsel %vm568_vm6, %v2371_v12, 128 }
 0x1be   :  { %664 = vmin.xlane.f32.xlu1 %v2409_v35  ;;  %678 = vmin.xlane.f32.xlu0 %v2411_v36  ;;  %v689_v41 = vshra.s32 %v2414_v37, 16  ;;  %v703_v3 = vshra.s32 %v2417_v38, 16 }
 0x1bf   :  { %v521_v42 = vpop.xlane.xlu1 %520  ;;  %v523_v4 = vpop.xlane.xlu0 %522 }
 0x1c0   :  { %vm569_vm7 = vcmp.eq.f32.partialorder %v2288_v9, %v521_v42  ;;  %vm570_vm8 = vcmp.eq.f32.partialorder %v2291_v10, %v523_v4  ;;  %v2425_v43 = vcvt.s32.f32 %v689_v41  ;;  %v2427_v44 = vcvt.s32.f32 %v703_v3 }
 0x1c1   :  { %v2430_v47 = vsel %vm569_vm7, %v2371_v12, 128  ;;  %v2433_v49 = vsel %vm570_vm8, %v2371_v12, 128 }
 0x1c2   :  { %692 = vmin.xlane.f32.xlu1 %v2425_v43  ;;  %706 = vmin.xlane.f32.xlu0 %v2427_v44  ;;  %v717_v51 = vshra.s32 %v2430_v47, 16  ;;  %v731_v9 = vshra.s32 %v2433_v49, 16 }
 0x1c3   :  { %v525_v52 = vpop.xlane.xlu1 %524  ;;  %v527_v10 = vpop.xlane.xlu0 %526 }
 0x1c4   :  { %vm571_vm9 = vcmp.eq.f32.partialorder %v2296_v15, %v525_v52  ;;  %vm572_vm10 = vcmp.eq.f32.partialorder %v2299_v16, %v527_v10  ;;  %v2441_v57 = vcvt.s32.f32 %v717_v51  ;;  %v2443_v58 = vcvt.s32.f32 %v731_v9 }
 0x1c5   :  { %v2446_v59 = vsel %vm571_vm9, %v2371_v12, 128  ;;  %v2449_v60 = vsel %vm572_vm10, %v2371_v12, 128 }
 0x1c6   :  { %720 = vmin.xlane.f32.xlu1 %v2441_v57  ;;  %734 = vmin.xlane.f32.xlu0 %v2443_v58  ;;  %v745_v1 = vshra.s32 %v2446_v59, 16  ;;  %v759_v15 = vshra.s32 %v2449_v60, 16 }
 0x1c7   :  { %v529_v2 = vpop.xlane.xlu1 %528  ;;  %v531_v16 = vpop.xlane.xlu0 %530 }
 0x1c8   :  { %vm573_vm11 = vcmp.eq.f32.partialorder %v2304_v21, %v529_v2  ;;  %vm574_vm12 = vcmp.eq.f32.partialorder %v2307_v22, %v531_v16  ;;  %v2457_v5 = vcvt.s32.f32 %v745_v1  ;;  %v2459_v11 = vcvt.s32.f32 %v759_v15 }
 0x1c9   :  { %v2462_v13 = vsel %vm573_vm11, %v2371_v12, 128  ;;  %v2465_v17 = vsel %vm574_vm12, %v2371_v12, 128 }
 0x1ca   :  { %748 = vmin.xlane.f32.xlu1 %v2457_v5  ;;  %762 = vmin.xlane.f32.xlu0 %v2459_v11  ;;  %v773_v18 = vshra.s32 %v2462_v13, 16  ;;  %v787_v21 = vshra.s32 %v2465_v17, 16 }
 0x1cb   :  { %v533_v19 = vpop.xlane.xlu1 %532  ;;  %v535_v22 = vpop.xlane.xlu0 %534 }
 0x1cc   :  { %vm575_vm13 = vcmp.eq.f32.partialorder %v2312_v27, %v533_v19  ;;  %vm576_vm14 = vcmp.eq.f32.partialorder %v2315_v28, %v535_v22  ;;  %v2473_v50 = vcvt.s32.f32 %v773_v18  ;;  %v2475_v24 = vcvt.s32.f32 %v787_v21 }
 0x1cd   :  { %v2478_v25 = vsel %vm575_vm13, %v2371_v12, 128  ;;  %v2481_v26 = vsel %vm576_vm14, %v2371_v12, 128 }
 0x1ce   :  { %776 = vmin.xlane.f32.xlu1 %v2473_v50  ;;  %790 = vmin.xlane.f32.xlu0 %v2475_v24  ;;  %v801_v31 = vshra.s32 %v2478_v25, 16  ;;  %v815_v27 = vshra.s32 %v2481_v26, 16 }
 0x1cf   :  { %v537_v61 = vpop.xlane.xlu1 %536  ;;  %v539_v28 = vpop.xlane.xlu0 %538 }
 0x1d0   :  { %vm577_vm15 = vcmp.eq.f32.partialorder %v2320_v33, %v537_v61  ;;  %vm578_vm0 = vcmp.eq.f32.partialorder %v2323_v34, %v539_v28  ;;  %v2489_v32 = vcvt.s32.f32 %v801_v31  ;;  %v2491_v62 = vcvt.s32.f32 %v815_v27 }
 0x1d1   :  { %v2494_v41 = vsel %vm577_vm15, %v2371_v12, 128  ;;  %v2497_v3 = vsel %vm578_vm0, %v2371_v12, 128 }
 0x1d2   :  { %804 = vmin.xlane.f32.xlu1 %v2489_v32  ;;  %818 = vmin.xlane.f32.xlu0 %v2491_v62  ;;  %v829_v42 = vshra.s32 %v2494_v41, 16  ;;  %v843_v33 = vshra.s32 %v2497_v3, 16 }
 0x1d3   :  { %v541_v4 = vpop.xlane.xlu1 %540  ;;  %v543_v34 = vpop.xlane.xlu0 %542 }
 0x1d4   :  { %vm579_vm1 = vcmp.eq.f32.partialorder %v2328_v39, %v541_v4  ;;  %vm580_vm2 = vcmp.eq.f32.partialorder %v2331_v40, %v543_v34  ;;  %v2505_v51 = vcvt.s32.f32 %v829_v42  ;;  %v2507_v9 = vcvt.s32.f32 %v843_v33 }
 0x1d5   :  { %v2510_v52 = vsel %vm579_vm1, %v2371_v12, 128  ;;  %v2513_v10 = vsel %vm580_vm2, %v2371_v12, 128 }
 0x1d6   :  { %832 = vmin.xlane.f32.xlu1 %v2505_v51  ;;  %846 = vmin.xlane.f32.xlu0 %v2507_v9  ;;  %v857_v1 = vshra.s32 %v2510_v52, 16  ;;  %v871_v39 = vshra.s32 %v2513_v10, 16 }
 0x1d7   :  { %v545_v15 = vpop.xlane.xlu1 %544  ;;  %v547_v40 = vpop.xlane.xlu0 %546 }
 0x1d8   :  { %vm581_vm3 = vcmp.eq.f32.partialorder %v2336_v45, %v545_v15  ;;  %vm582_vm4 = vcmp.eq.f32.partialorder %v2339_v46, %v547_v40  ;;  %v2521_v2 = vcvt.s32.f32 %v857_v1  ;;  %v2523_v16 = vcvt.s32.f32 %v871_v39 }
 0x1d9   :  { %v2526_v18 = vsel %vm581_vm3, %v2371_v12, 128  ;;  %v2529_v21 = vsel %vm582_vm4, %v2371_v12, 128 }
 0x1da   :  { %860 = vmin.xlane.f32.xlu1 %v2521_v2  ;;  %874 = vmin.xlane.f32.xlu0 %v2523_v16  ;;  %v885_v19 = vshra.s32 %v2526_v18, 16  ;;  %v899_v45 = vshra.s32 %v2529_v21, 16 }
 0x1db   :  { %v549_v22 = vpop.xlane.xlu1 %548  ;;  %v551_v46 = vpop.xlane.xlu0 %550 }
 0x1dc   :  { %vm583_vm5 = vcmp.eq.f32.partialorder %v2344_v53, %v549_v22  ;;  %vm584_vm6 = vcmp.eq.f32.partialorder %v2347_v54, %v551_v46  ;;  %v2537_v31 = vcvt.s32.f32 %v885_v19  ;;  %v2539_v27 = vcvt.s32.f32 %v899_v45 }
 0x1dd   :  { %v2542_v61 = vsel %vm583_vm5, %v2371_v12, 128  ;;  %v2545_v28 = vsel %vm584_vm6, %v2371_v12, 128 }
 0x1de   :  { %888 = vmin.xlane.f32.xlu1 %v2537_v31  ;;  %902 = vmin.xlane.f32.xlu0 %v2539_v27  ;;  %v913_v42 = vshra.s32 %v2542_v61, 16  ;;  %v927_v53 = vshra.s32 %v2545_v28, 16 }
 0x1df   :  { %v553_v33 = vpop.xlane.xlu1 %552  ;;  %v555_v54 = vpop.xlane.xlu0 %554 }
 0x1e0   :  { %vm585_vm7 = vcmp.eq.f32.partialorder %v2352_v63, %v553_v33  ;;  %vm586_vm8 = vcmp.eq.f32.partialorder %v2355_v0, %v555_v54  ;;  %v2553_v4 = vcvt.s32.f32 %v913_v42  ;;  %v2555_v34 = vcvt.s32.f32 %v927_v53 }
 0x1e1   :  { %v2558_v1 = vsel %vm585_vm7, %v2371_v12, 128  ;;  %v2561_v39 = vsel %vm586_vm8, %v2371_v12, 128 }
 0x1e2   :  { %916 = vmin.xlane.f32.xlu1 %v2553_v4  ;;  %930 = vmin.xlane.f32.xlu0 %v2555_v34  ;;  %v941_v15 = vshra.s32 %v2558_v1, 16  ;;  %v955_v63 = vshra.s32 %v2561_v39, 16 }
 0x1e3   :  { %v557_v40 = vpop.xlane.xlu1 %556  ;;  %v559_v0 = vpop.xlane.xlu0 %558 }
 0x1e4   :  { %vm587_vm9 = vcmp.eq.f32.partialorder %v2360_v6, %v557_v40  ;;  %vm588_vm10 = vcmp.eq.f32.partialorder %v2363_v7, %v559_v0  ;;  %v2569_v19 = vcvt.s32.f32 %v941_v15  ;;  %v2571_v45 = vcvt.s32.f32 %v955_v63 }
 0x1e5   :  { %v2574_v22 = vsel %vm587_vm9, %v2371_v12, 128  ;;  %v2577_v46 = vsel %vm588_vm10, %v2371_v12, 128  ;;  %v618_v40 = vand.u32 65535, %v2375_v14  ;;  %v646_v0 = vand.u32 65535, %v2386_v23 }
 0x1e6   :  { %944 = vmin.xlane.f32.xlu1 %v2569_v19  ;;  %958 = vmin.xlane.f32.xlu0 %v2571_v45  ;;  %v969_v42 = vshra.s32 %v2574_v22, 16  ;;  %v983_v6 = vshra.s32 %v2577_v46, 16 }
 0x1e7   :  { %v561_v53 = vpop.xlane.xlu1 %560 }
 0x1e8   :  { %vm589_vm11 = vcmp.eq.f32.partialorder %v2368_v8, %v561_v53  ;;  %v2584_v7 = vcvt.s32.f32 %v969_v42  ;;  %v2586_v33 = vcvt.s32.f32 %v983_v6  ;;  %v632_v8 = vand.u32 65535, %v2383_v20 }
 0x1e9   :  { %v2589_v54 = vsel %vm589_vm11, %v2371_v12, 128  ;;  %v620_v6 = vcvt.s32.f32 %v618_v40  ;;  %v660_v12 = vand.u32 65535, %v2398_v29  ;;  %v648_v20 = vcvt.s32.f32 %v646_v0 }
 0x1ea   :  { %2960 = vst [vmem:[#allocation19_spill] sm:$0xff] %v2586_v33  ;;  %972 = vmin.xlane.f32.xlu1 %v2584_v7  ;;  %986 = vmin.xlane.f32.xlu0 %v2586_v33  ;;  %v997_v15 = vshra.s32 %v2589_v54, 16  ;;  %v634_v14 = vcvt.s32.f32 %v632_v8  ;;  %v688_v29 = vand.u32 65535, %v2414_v37  ;;  %v716_v37 = vand.u32 65535, %v2430_v47 }
 0x1eb   :  { %v662_v8 = vcvt.s32.f32 %v660_v12  ;;  %v744_v47 = vand.u32 65535, %v2446_v59  ;;  %v772_v59 = vand.u32 65535, %v2462_v13  ;;  %v800_v13 = vand.u32 65535, %v2478_v25 }
 0x1ec   :  { %v2594_v63 = vcvt.s32.f32 %v997_v15  ;;  %v674_v15 = vand.u32 65535, %v2401_v30  ;;  %v702_v30 = vand.u32 65535, %v2417_v38  ;;  %v730_v38 = vand.u32 65535, %v2433_v49 }
 0x1ed   :  { %v690_v12 = vcvt.s32.f32 %v688_v29  ;;  %v758_v49 = vand.u32 65535, %v2449_v60  ;;  %v786_v60 = vand.u32 65535, %v2465_v17  ;;  %v814_v17 = vand.u32 65535, %v2481_v26 }
 0x1ee   :  { %2961 = vst [vmem:[#allocation20_spill] sm:$0xff] %v2594_v63  ;;  %1000 = vmin.xlane.f32.xlu1 %v2594_v63  ;;  %v676_v0 = vcvt.s32.f32 %v674_v15  ;;  %v704_v15 = vcvt.s32.f32 %v702_v30  ;;  %v732_v29 = vcvt.s32.f32 %v730_v38  ;;  %v774_v38 = vcvt.s32.f32 %v772_v59 }
 0x1ef   :  { %v828_v25 = vand.u32 65535, %v2494_v41  ;;  %v842_v26 = vand.u32 65535, %v2497_v3  ;;  %v856_v41 = vand.u32 65535, %v2510_v52  ;;  %v870_v3 = vand.u32 65535, %v2513_v10 }
 0x1f0   :  { %v884_v52 = vand.u32 65535, %v2526_v18  ;;  %v898_v10 = vand.u32 65535, %v2529_v21  ;;  %v912_v18 = vand.u32 65535, %v2542_v61  ;;  %v926_v21 = vand.u32 65535, %v2545_v28 }
 0x1f1   :  { %v940_v61 = vand.u32 65535, %v2558_v1  ;;  %v954_v28 = vand.u32 65535, %v2561_v39  ;;  %v968_v1 = vand.u32 65535, %v2574_v22  ;;  %v982_v39 = vand.u32 65535, %v2577_v46 }
 0x1f2   :  { %v996_v22 = vand.u32 65535, %v2589_v54 }
 0x1f5   :  { %v2963_v54 = vld [vmem:[#allocation20_spill] sm:$0xff] }
 0x23f   :  { %v2600_v42 = vpop.xlane.xlu0 %622 }
 0x240   :  { %vm624_vm12 = vcmp.eq.f32.partialorder %v2380_v48, %v2600_v42 }
 0x241   :  { %v625_v53 = vsel %vm624_vm12, %v620_v6, inf }
 0x242   :  { %626 = vmin.xlane.f32.xlu0 %v625_v53 }
 0x243   :  { %v2606_v33 = vpop.xlane.xlu1 %636  ;;  %v2608_v63 = vpop.xlane.xlu0 %650 }
 0x244   :  { %vm638_vm13 = vcmp.eq.f32.partialorder %v2393_v55, %v2606_v33  ;;  %vm652_vm14 = vcmp.eq.f32.partialorder %v2395_v56, %v2608_v63 }
 0x245   :  { %v639_v23 = vsel %vm638_vm13, %v634_v14, inf  ;;  %v653_v48 = vsel %vm652_vm14, %v648_v20, inf }
 0x246   :  { %640 = vmin.xlane.f32.xlu1 %v639_v23  ;;  %654 = vmin.xlane.f32.xlu0 %v653_v48  ;;  %v718_v48 = vcvt.s32.f32 %v716_v37 }
 0x247   :  { %v2616_v40 = vpop.xlane.xlu1 %664  ;;  %v2618_v6 = vpop.xlane.xlu0 %678 }
 0x248   :  { %vm666_vm15 = vcmp.eq.f32.partialorder %v2409_v35, %v2616_v40  ;;  %vm680_vm0 = vcmp.eq.f32.partialorder %v2411_v36, %v2618_v6 }
 0x249   :  { %v667_v55 = vsel %vm666_vm15, %v662_v8, inf  ;;  %v681_v56 = vsel %vm680_vm0, %v676_v0, inf  ;;  %v746_v0 = vcvt.s32.f32 %v744_v47  ;;  %v816_v47 = vcvt.s32.f32 %v814_v17 }
 0x24a   :  { %668 = vmin.xlane.f32.xlu1 %v667_v55  ;;  %682 = vmin.xlane.f32.xlu0 %v681_v56  ;;  %v760_v55 = vcvt.s32.f32 %v758_v49 }
 0x24b   :  { %v2626_v53 = vpop.xlane.xlu1 %692  ;;  %v2628_v14 = vpop.xlane.xlu0 %706 }
 0x24c   :  { %vm694_vm1 = vcmp.eq.f32.partialorder %v2425_v43, %v2626_v53  ;;  %vm708_vm2 = vcmp.eq.f32.partialorder %v2427_v44, %v2628_v14 }
 0x24d   :  { %v695_v35 = vsel %vm694_vm1, %v690_v12, inf  ;;  %v709_v36 = vsel %vm708_vm2, %v704_v15, inf  ;;  %v788_v12 = vcvt.s32.f32 %v786_v60  ;;  %v858_v60 = vcvt.s32.f32 %v856_v41 }
 0x24e   :  { %696 = vmin.xlane.f32.xlu1 %v695_v35  ;;  %710 = vmin.xlane.f32.xlu0 %v709_v36  ;;  %v802_v36 = vcvt.s32.f32 %v800_v13  ;;  %v900_v13 = vcvt.s32.f32 %v898_v10  ;;  %v685_v10 = vcvt.f32.s32 %v2618_v6 }
 0x24f   :  { %v2636_v20 = vpop.xlane.xlu1 %720  ;;  %v2638_v23 = vpop.xlane.xlu0 %734 }
 0x250   :  { %vm722_vm3 = vcmp.eq.f32.partialorder %v2441_v57, %v2636_v20  ;;  %vm736_vm4 = vcmp.eq.f32.partialorder %v2443_v58, %v2638_v23 }
 0x251   :  { %v723_v43 = vsel %vm722_vm3, %v718_v48, inf  ;;  %v737_v44 = vsel %vm736_vm4, %v732_v29, inf  ;;  %v830_v29 = vcvt.s32.f32 %v828_v25 }
 0x252   :  { %724 = vmin.xlane.f32.xlu1 %v723_v43  ;;  %738 = vmin.xlane.f32.xlu0 %v737_v44  ;;  %v844_v43 = vcvt.s32.f32 %v842_v26  ;;  %v942_v26 = vcvt.s32.f32 %v940_v61 }
 0x253   :  { %v2646_v30 = vpop.xlane.xlu1 %748  ;;  %v2648_v8 = vpop.xlane.xlu0 %762 }
 0x254   :  { %vm750_vm5 = vcmp.eq.f32.partialorder %v2457_v5, %v2646_v30  ;;  %vm764_vm6 = vcmp.eq.f32.partialorder %v2459_v11, %v2648_v8 }
 0x255   :  { %v751_v57 = vsel %vm750_vm5, %v746_v0, inf  ;;  %v765_v58 = vsel %vm764_vm6, %v760_v55, inf  ;;  %v872_v0 = vcvt.s32.f32 %v870_v3 }
 0x256   :  { %752 = vmin.xlane.f32.xlu1 %v751_v57  ;;  %766 = vmin.xlane.f32.xlu0 %v765_v58  ;;  %v886_v58 = vcvt.s32.f32 %v884_v52  ;;  %v671_v52 = vcvt.f32.s32 %v2616_v40 }
 0x257   :  { %v2656_v56 = vpop.xlane.xlu1 %776  ;;  %v2658_v37 = vpop.xlane.xlu0 %790 }
 0x258   :  { %vm778_vm7 = vcmp.eq.f32.partialorder %v2473_v50, %v2656_v56  ;;  %vm792_vm8 = vcmp.eq.f32.partialorder %v2475_v24, %v2658_v37 }
 0x259   :  { %v779_v5 = vsel %vm778_vm7, %v774_v38, inf  ;;  %v793_v11 = vsel %vm792_vm8, %v788_v12, inf  ;;  %v914_v12 = vcvt.s32.f32 %v912_v18 }
 0x25a   :  { %780 = vmin.xlane.f32.xlu1 %v779_v5  ;;  %794 = vmin.xlane.f32.xlu0 %v793_v11  ;;  %v928_v5 = vcvt.s32.f32 %v926_v21  ;;  %v727_v21 = vcvt.f32.s32 %v2636_v20 }
 0x25b   :  { %v2666_v15 = vpop.xlane.xlu1 %804  ;;  %v2668_v35 = vpop.xlane.xlu0 %818 }
 0x25c   :  { %vm806_vm9 = vcmp.eq.f32.partialorder %v2489_v32, %v2666_v15  ;;  %vm820_vm10 = vcmp.eq.f32.partialorder %v2491_v62, %v2668_v35  ;;  %v811_v20 = vcvt.f32.s32 %v2666_v15 }
 0x25d   :  { %v807_v50 = vsel %vm806_vm9, %v802_v36, inf  ;;  %v821_v24 = vsel %vm820_vm10, %v816_v47, inf  ;;  %v956_v36 = vcvt.s32.f32 %v954_v28 }
 0x25e   :  { %808 = vmin.xlane.f32.xlu1 %v807_v50  ;;  %822 = vmin.xlane.f32.xlu0 %v821_v24  ;;  %v970_v50 = vcvt.s32.f32 %v968_v1  ;;  %v984_v24 = vcvt.s32.f32 %v982_v39 }
 0x25f   :  { %v2676_v49 = vpop.xlane.xlu1 %832  ;;  %v2678_v48 = vpop.xlane.xlu0 %846 }
 0x260   :  { %vm834_vm11 = vcmp.eq.f32.partialorder %v2505_v51, %v2676_v49  ;;  %vm848_vm12 = vcmp.eq.f32.partialorder %v2507_v9, %v2678_v48 }
 0x261   :  { %v835_v32 = vsel %vm834_vm11, %v830_v29, inf  ;;  %v849_v62 = vsel %vm848_vm12, %v844_v43, inf  ;;  %v998_v29 = vcvt.s32.f32 %v996_v22 }
 0x262   :  { %836 = vmin.xlane.f32.xlu1 %v835_v32  ;;  %850 = vmin.xlane.f32.xlu0 %v849_v62  ;;  %v629_v32 = vcvt.f32.s32 %v2600_v42  ;;  %v643_v62 = vcvt.f32.s32 %v2606_v33  ;;  %v2747_v42 = vshll.u32 %v685_v10, 16  ;;  %v741_v33 = vcvt.f32.s32 %v2638_v23 }
 0x263   :  { %v2686_v44 = vpop.xlane.xlu1 %860  ;;  %v2688_v59 = vpop.xlane.xlu0 %874  ;;  %v839_v23 = vcvt.f32.s32 %v2676_v49  ;;  %v2777_v49 = vshll.u32 %v811_v20, 16 }
 0x264   :  { %vm862_vm13 = vcmp.eq.f32.partialorder %v2521_v2, %v2686_v44  ;;  %vm876_vm14 = vcmp.eq.f32.partialorder %v2523_v16, %v2688_v59  ;;  %v2764_v61 = vshll.u32 %v741_v33, 16 }
 0x265   :  { %v863_v51 = vsel %vm862_vm13, %v858_v60, inf  ;;  %v877_v9 = vsel %vm876_vm14, %v872_v0, inf  ;;  %v699_v60 = vcvt.f32.s32 %v2626_v53  ;;  %v713_v0 = vcvt.f32.s32 %v2628_v14 }
 0x266   :  { %864 = vmin.xlane.f32.xlu1 %v863_v51  ;;  %878 = vmin.xlane.f32.xlu0 %v877_v9  ;;  %v630_v51 = vshll.u32 %v629_v32, 16  ;;  %v644_v9 = vshll.u32 %v643_v62, 16  ;;  %v769_v53 = vcvt.f32.s32 %v2648_v8  ;;  %v783_v14 = vcvt.f32.s32 %v2656_v56 }
 0x267   :  { %v2696_v55 = vpop.xlane.xlu1 %888  ;;  %v2698_v57 = vpop.xlane.xlu0 %902  ;;  %v2751_v40 = vshll.u32 %v699_v60, 16  ;;  %v2753_v6 = vshll.u32 %v713_v0, 16  ;;  %v867_v8 = vcvt.f32.s32 %v2686_v44  ;;  %v881_v56 = vcvt.f32.s32 %v2688_v59 }
 0x268   :  { %vm890_vm15 = vcmp.eq.f32.partialorder %v2537_v31, %v2696_v55  ;;  %vm904_vm0 = vcmp.eq.f32.partialorder %v2539_v27, %v2698_v57  ;;  %v2772_v15 = vshll.u32 %v783_v14, 16  ;;  %v2782_v1 = vshll.u32 %v839_v23, 16 }
 0x269   :  { %v891_v2 = vsel %vm890_vm15, %v886_v58, inf  ;;  %v905_v16 = vsel %vm904_vm0, %v900_v13, inf  ;;  %v2745_v58 = vshll.u32 %v671_v52, 16  ;;  %v797_v13 = vcvt.f32.s32 %v2658_v37 }
 0x26a   :  { %892 = vmin.xlane.f32.xlu1 %v891_v2  ;;  %906 = vmin.xlane.f32.xlu0 %v905_v16  ;;  %v825_v2 = vcvt.f32.s32 %v2668_v35  ;;  %v2760_v16 = vshll.u32 %v727_v21, 16  ;;  %v2770_v37 = vshll.u32 %v769_v53, 16  ;;  %v895_v35 = vcvt.f32.s32 %v2696_v55 }
 0x26b   :  { %v2706_v17 = vpop.xlane.xlu1 %916  ;;  %v2708_v38 = vpop.xlane.xlu0 %930 }
 0x26c   :  { %vm918_vm1 = vcmp.eq.f32.partialorder %v2553_v4, %v2706_v17  ;;  %vm932_vm2 = vcmp.eq.f32.partialorder %v2555_v34, %v2708_v38  ;;  %v923_v59 = vcvt.f32.s32 %v2706_v17  ;;  %v937_v55 = vcvt.f32.s32 %v2708_v38 }
 0x26d   :  { %v919_v31 = vsel %vm918_vm1, %v914_v12, inf  ;;  %v933_v27 = vsel %vm932_vm2, %v928_v5, inf  ;;  %v2202_v38 = vmov 1.0  }
 0x26e   :  { %920 = vmin.xlane.f32.xlu1 %v919_v31  ;;  %934 = vmin.xlane.f32.xlu0 %v933_v27  ;;  %v2775_v31 = vshll.u32 %v797_v13, 16  ;;  %v909_v27 = vcvt.f32.s32 %v2698_v57 }
 0x26f   :  { %v2716_v11 = vpop.xlane.xlu1 %944  ;;  %v2718_v25 = vpop.xlane.xlu0 %958 }
 0x270   :  { %vm946_vm3 = vcmp.eq.f32.partialorder %v2569_v19, %v2716_v11  ;;  %vm960_vm4 = vcmp.eq.f32.partialorder %v2571_v45, %v2718_v25  ;;  %v2962_v19 = vld [vmem:[#allocation19_spill] sm:$0xff]  ;;  %v965_v17 = vcvt.f32.s32 %v2718_v25 }
 0x271   :  { %v947_v4 = vsel %vm946_vm3, %v942_v26, inf  ;;  %v961_v34 = vsel %vm960_vm4, %v956_v36, inf  ;;  %v2787_v26 = vshll.u32 %v867_v8, 16  ;;  %v2789_v36 = vshll.u32 %v881_v56, 16 }
 0x272   :  { %948 = vmin.xlane.f32.xlu1 %v947_v4  ;;  %962 = vmin.xlane.f32.xlu0 %v961_v34  ;;  %v951_v4 = vcvt.f32.s32 %v2716_v11  ;;  %v2802_v11 = vshll.u32 %v923_v59, 16  ;;  %v2811_v33 = vshll.u32 %v965_v17, 16 }
 0x273   :  { %v2725_v47 = vpop.xlane.xlu1 %972  ;;  %v2727_v46 = vpop.xlane.xlu0 %986 }
 0x274   :  { %vm974_vm5 = vcmp.eq.f32.partialorder %v2584_v7, %v2725_v47  ;;  %vm988_vm6 = vcmp.eq.f32.partialorder %v2962_v19, %v2727_v46  ;;  %v657_v7 = vcvt.f32.s32 %v2608_v63  ;;  %v755_v63 = vcvt.f32.s32 %v2646_v30  ;;  %v2964_v19 = vld [vmem:[#allocation18_spill] sm:$0xff] }
 0x275   :  { %v975_v41 = vsel %vm974_vm5, %v970_v50, inf  ;;  %v989_v45 = vsel %vm988_vm6, %v984_v24, inf  ;;  %v853_v30 = vcvt.f32.s32 %v2678_v48  ;;  %v2779_v48 = vshll.u32 %v825_v2, 16 }
 0x276   :  { %976 = vmin.xlane.f32.xlu1 %v975_v41  ;;  %990 = vmin.xlane.f32.xlu0 %v989_v45  ;;  %v658_v18 = vshll.u32 %v657_v7, 16  ;;  %v2766_v28 = vshll.u32 %v755_v63, 16  ;;  %v2793_v50 = vshll.u32 %v895_v35, 16  ;;  %v2796_v41 = vshll.u32 %v909_v27, 16 }
 0x277   :  { %v2733_v3 = vpop.xlane.xlu1 %1000  ;;  %v2784_v44 = vshll.u32 %v853_v30, 16  ;;  %v979_v45 = vcvt.f32.s32 %v2725_v47  ;;  %v2804_v7 = vshll.u32 %v937_v55, 16  ;;  %v2806_v52 = vshll.u32 %v951_v4, 16 }
 0x278   :  { %vm1002_vm7 = vcmp.eq.f32.partialorder %v2963_v54, %v2733_v3  ;;  %v993_v10 = vcvt.f32.s32 %v2727_v46  ;;  %v1007_v25 = vcvt.f32.s32 %v2733_v3 }
 0x279   :  { %v1003_v43 = vsel %vm1002_vm7, %v998_v29, inf  ;;  %v2201_v29 = vmov 0.0  }
 0x27a   :  { %1004 = vmin.xlane.f32.xlu1 %v1003_v43  ;;  %v2820_v14 = vshll.u32 %v993_v10, 16  ;;  %v2822_v13 = vshll.u32 %v1007_v25, 16 }
 0x2cb   :  { %v627_v12 = vpop.xlane.xlu0 %626 }
 0x2cc   :  { %v628_v5 = vcvt.f32.s32 %v627_v12 }
 0x2ce   :  { %v631_v39 = vadd.s32 %v630_v51, %v628_v5 }
 0x2cf   :  { %v641_v34 = vpop.xlane.xlu1 %640  ;;  %v655_v22 = vpop.xlane.xlu0 %654 }
 0x2d0   :  { %v642_v57 = vcvt.f32.s32 %v641_v34  ;;  %v656_v24 = vcvt.f32.s32 %v655_v22  ;;  %vm1010_vm8 = vcmp.eq.s32.totalorder %v2964_v19, %v631_v39 }
 0x2d1   :  { %v1681_v54 = vsel %vm1010_vm8, 1.0, %v2201_v29  ;;  %1931 = vmatprep.mubr.msk.f32.mxu1 %vm1010_vm8, %v2202_v38 }
 0x2d2   :  { %v645_v43 = vadd.s32 %v644_v9, %v642_v57  ;;  %v659_v32 = vadd.s32 %v658_v18, %v656_v24  ;;  %v1327_v62 = vmax.f32 %v1681_v54, -128.0  ;;  %v2813_v9 = vshll.u32 %v979_v45, 16 }
 0x2d3   :  { %v669_v47 = vpop.xlane.xlu1 %668  ;;  %v683_v60 = vpop.xlane.xlu0 %682 }
 0x2d4   :  { %vm1011_vm9 = vcmp.eq.s32.totalorder %v2964_v19, %v645_v43  ;;  %v1355_v0 = vmin.f32 %v1327_v62, 127.0  ;;  %v670_v51 = vcvt.f32.s32 %v669_v47  ;;  %v684_v21 = vcvt.f32.s32 %v683_v60 }
 0x2d5   :  { %v1682_v18 = vsel %vm1011_vm9, 1.0, %v2201_v29  ;;  %1932 = vmatmul.mubr.msk.f32.vlgmr.msra.gmra.mxu1 %vm1011_vm9, %v2202_v38  ;;  %vm1012_vm10 = vcmp.eq.s32.totalorder %v2964_v19, %v659_v32 }
 0x2d6   :  { %v1328_v46 = vmax.f32 %v1682_v18, -128.0  ;;  %v1973_v63 = vtrunc.f32 %v1355_v0  ;;  %v1523_v3 = vadd.f32 %v1682_v18, %v1681_v54  ;;  %v673_v53 = vadd.s32 %v2745_v58, %v670_v51  ;;  %1934 = vmatprep.mubr.msk.f32.mxu1 %vm1012_vm10, %v2202_v38 }
 0x2d7   :  { %v687_v20 = vadd.s32 %v2747_v42, %v684_v21  ;;  %v1683_v2 = vsel %vm1012_vm10, 1.0, %v2201_v29  ;;  %v697_v23 = vpop.xlane.xlu1 %696  ;;  %v711_v30 = vpop.xlane.xlu0 %710 }
 0x2d8   :  { %v1356_v8 = vmin.f32 %v1328_v46, 127.0  ;;  %v2826_v56 = vcvt.f32.s32 %v1973_v63  ;;  %v1329_v12 = vmax.f32 %v1683_v2, -128.0  ;;  %v1524_v35 = vadd.f32 %v1683_v2, %v1523_v3 }
 0x2d9   :  { %v698_v5 = vcvt.f32.s32 %v697_v23  ;;  %v712_v27 = vcvt.f32.s32 %v711_v30  ;;  %vm1013_vm11 = vcmp.eq.s32.totalorder %v2964_v19, %v673_v53  ;;  %vm1014_vm12 = vcmp.eq.s32.totalorder %v2964_v19, %v687_v20 }
 0x2da   :  { %v1975_v58 = vtrunc.f32 %v1356_v8  ;;  %v1357_v59 = vmin.f32 %v1329_v12, 127.0  ;;  %v1684_v39 = vsel %vm1013_vm11, 1.0, %v2201_v29  ;;  %1935 = vmatmul.mubr.msk.f32.gmra.mxu1 %vm1013_vm11, %v2202_v38  ;;  %v1685_v42 = vsel %vm1014_vm12, 1.0, %v2201_v29 }
 0x2db   :  { %v701_v55 = vadd.s32 %v2751_v40, %v698_v5  ;;  %v715_v4 = vadd.s32 %v2753_v6, %v712_v27  ;;  %v1330_v34 = vmax.f32 %v1684_v39, -128.0  ;;  %v1525_v22 = vadd.f32 %v1684_v39, %v1524_v35  ;;  %1937 = vmatprep.mubr.msk.f32.mxu1 %vm1014_vm12, %v2202_v38  ;;  %v725_v57 = vpop.xlane.xlu1 %724  ;;  %v739_v24 = vpop.xlane.xlu0 %738 }
 0x2dc   :  { %v1976_v17 = vcvt.f32.s32 %v1975_v58  ;;  %v1977_v45 = vtrunc.f32 %v1357_v59  ;;  %v1331_v54 = vmax.f32 %v1685_v42, -128.0  ;;  %v726_v43 = vcvt.f32.s32 %v725_v57 }
 0x2dd   :  { %v1358_v32 = vmin.f32 %v1330_v34, 127.0  ;;  %v1526_v62 = vadd.f32 %v1685_v42, %v1525_v22  ;;  %v740_v10 = vcvt.f32.s32 %v739_v24  ;;  %vm1015_vm13 = vcmp.eq.s32.totalorder %v2964_v19, %v701_v55 }
 0x2de   :  { %v1411_v25 = vpack.c.b16 %v1976_v17, %v2826_v56  ;;  %v1978_v40 = vcvt.f32.s32 %v1977_v45  ;;  %v1359_v47 = vmin.f32 %v1331_v54, 127.0  ;;  %v729_v6 = vadd.s32 %v2760_v16, %v726_v43  ;;  %1938 = vmatmul.mubr.msk.f32.gmra.mxu1 %vm1015_vm13, %v2202_v38 }
 0x2df   :  { %v1979_v60 = vtrunc.f32 %v1358_v32  ;;  %v743_v0 = vadd.s32 %v2764_v61, %v740_v10  ;;  %v1686_v51 = vsel %vm1015_vm13, 1.0, %v2201_v29  ;;  %vm1016_vm14 = vcmp.eq.s32.totalorder %v2964_v19, %v715_v4  ;;  %v753_v21 = vpop.xlane.xlu1 %752  ;;  %v767_v18 = vpop.xlane.xlu0 %766 }
 0x2e0   :  { %v1981_v46 = vtrunc.f32 %v1359_v47  ;;  %v1332_v63 = vmax.f32 %v1686_v51, -128.0  ;;  %v1527_v3 = vadd.f32 %v1686_v51, %v1526_v62  ;;  %v1687_v53 = vsel %vm1016_vm14, 1.0, %v2201_v29  ;;  %1940 = vmatprep.mubr.msk.f32.mxu1 %vm1016_vm14, %v2202_v38 }
 0x2e1   :  { %v1980_v20 = vcvt.f32.s32 %v1979_v60  ;;  %v1333_v16 = vmax.f32 %v1687_v53, -128.0  ;;  %v754_v2 = vcvt.f32.s32 %v753_v21  ;;  %v768_v23 = vcvt.f32.s32 %v767_v18 }
 0x2e2   :  { %v2845_v30 = vcvt.f32.s32 %v1981_v46  ;;  %v1360_v61 = vmin.f32 %v1332_v63, 127.0  ;;  %v1528_v8 = vadd.f32 %v1687_v53, %v1527_v3  ;;  %vm1017_vm15 = vcmp.eq.s32.totalorder %v2964_v19, %v729_v6 }
 0x2e3   :  { %v1412_v56 = vpack.c.b16 %v1980_v20, %v1978_v40  ;;  %v1361_v12 = vmin.f32 %v1333_v16, 127.0  ;;  %v757_v35 = vadd.s32 %v2766_v28, %v754_v2  ;;  %v771_v5 = vadd.s32 %v2770_v37, %v768_v23  ;;  %1941 = vmatmul.mubr.msk.f32.gmra.mxu1 %vm1017_vm15, %v2202_v38  ;;  %v781_v27 = vpop.xlane.xlu1 %780  ;;  %v795_v58 = vpop.xlane.xlu0 %794 }
 0x2e4   :  { %v1983_v59 = vtrunc.f32 %v1360_v61  ;;  %v1688_v39 = vsel %vm1017_vm15, 1.0, %v2201_v29  ;;  %vm1018_vm0 = vcmp.eq.s32.totalorder %v2964_v19, %v743_v0  ;;  %v782_v42 = vcvt.f32.s32 %v781_v27 }
 0x2e5   :  { %v1413_v55 = vpack.c.b8 %v1412_v56, %v1411_v25  ;;  %v1985_v4 = vtrunc.f32 %v1361_v12  ;;  %v1334_v34 = vmax.f32 %v1688_v39, -128.0  ;;  %v1529_v22 = vadd.f32 %v1688_v39, %v1528_v8  ;;  %1943 = vmatprep.mubr.msk.f32.mxu1 %vm1018_vm0, %v2202_v38 }
 0x2e6   :  { %v1984_v57 = vcvt.f32.s32 %v1983_v59  ;;  %v1689_v28 = vsel %vm1018_vm0, 1.0, %v2201_v29  ;;  %v785_v37 = vadd.s32 %v2772_v15, %v782_v42  ;;  %v796_v24 = vcvt.f32.s32 %v795_v58 }
 0x2e7   :  { %1432 = vst [vmem:[#allocation8] sm:$0xff] %v1413_v55  ;;  %v1986_v17 = vcvt.f32.s32 %v1985_v4  ;;  %v1362_v45 = vmin.f32 %v1334_v34, 127.0  ;;  %v1335_v54 = vmax.f32 %v1689_v28, -128.0  ;;  %v1530_v43 = vadd.f32 %v1689_v28, %v1529_v22  ;;  %v809_v32 = vpop.xlane.xlu1 %808  ;;  %v823_v62 = vpop.xlane.xlu0 %822 }
 0x2e8   :  { %v1414_v10 = vpack.c.b16 %v1984_v57, %v2845_v30  ;;  %v799_v25 = vadd.s32 %v2775_v31, %v796_v24  ;;  %vm1019_vm1 = vcmp.eq.s32.totalorder %v2964_v19, %v757_v35  ;;  %vm1020_vm2 = vcmp.eq.s32.totalorder %v2964_v19, %v771_v5 }
 0x2e9   :  { %v1987_v40 = vtrunc.f32 %v1362_v45  ;;  %v1363_v47 = vmin.f32 %v1335_v54, 127.0  ;;  %v1690_v15 = vsel %vm1019_vm1, 1.0, %v2201_v29  ;;  %1944 = vmatmul.mubr.msk.f32.gmra.mxu1 %vm1019_vm1, %v2202_v38  ;;  %v1691_v6 = vsel %vm1020_vm2, 1.0, %v2201_v29 }
 0x2ea   :  { %v1336_v60 = vmax.f32 %v1690_v15, -128.0  ;;  %v1531_v0 = vadd.f32 %v1690_v15, %v1530_v43  ;;  %1946 = vmatprep.mubr.msk.f32.mxu1 %vm1020_vm2, %v2202_v38  ;;  %v1337_v51 = vmax.f32 %v1691_v6, -128.0  ;;  %v810_v21 = vcvt.f32.s32 %v809_v32 }
 0x2eb   :  { %v1988_v18 = vcvt.f32.s32 %v1987_v40  ;;  %v1989_v31 = vtrunc.f32 %v1363_v47  ;;  %v824_v46 = vcvt.f32.s32 %v823_v62  ;;  %vm1021_vm3 = vcmp.eq.s32.totalorder %v2964_v19, %v785_v37  ;;  %v837_v63 = vpop.xlane.xlu1 %836  ;;  %v851_v3 = vpop.xlane.xlu0 %850 }
 0x2ec   :  { %v1364_v53 = vmin.f32 %v1336_v60, 127.0  ;;  %v1365_v20 = vmin.f32 %v1337_v51, 127.0  ;;  %v1532_v16 = vadd.f32 %v1691_v6, %v1531_v0  ;;  %v813_v2 = vadd.s32 %v2777_v49, %v810_v21 }
 0x2ed   :  { %v1415_v23 = vpack.c.b16 %v1988_v18, %v1986_v17  ;;  %v1990_v30 = vcvt.f32.s32 %v1989_v31  ;;  %v827_v61 = vadd.s32 %v2779_v48, %v824_v46  ;;  %v1692_v8 = vsel %vm1021_vm3, 1.0, %v2201_v29  ;;  %1947 = vmatmul.mubr.msk.f32.gmra.mxu1 %vm1021_vm3, %v2202_v38 }
 0x2ee   :  { %v1991_v56 = vtrunc.f32 %v1364_v53  ;;  %v1993_v12 = vtrunc.f32 %v1365_v20  ;;  %v1338_v35 = vmax.f32 %v1692_v8, -128.0  ;;  %v1533_v5 = vadd.f32 %v1692_v8, %v1532_v16 }
 0x2ef   :  { %v1416_v27 = vpack.c.b8 %v1415_v23, %v1414_v10  ;;  %vm1022_vm4 = vcmp.eq.s32.totalorder %v2964_v19, %v799_v25  ;;  %v838_v58 = vcvt.f32.s32 %v837_v63  ;;  %v852_v59 = vcvt.f32.s32 %v851_v3  ;;  %v865_v39 = vpop.xlane.xlu1 %864  ;;  %v879_v42 = vpop.xlane.xlu0 %878 }
 0x2f0   :  { %v1992_v49 = vcvt.f32.s32 %v1991_v56  ;;  %v1994_v55 = vcvt.f32.s32 %v1993_v12  ;;  %v1366_v4 = vmin.f32 %v1338_v35, 127.0  ;;  %v1693_v48 = vsel %vm1022_vm4, 1.0, %v2201_v29  ;;  %1949 = vmatprep.mubr.msk.f32.mxu1 %vm1022_vm4, %v2202_v38 }
 0x2f1   :  { %1433 = vst [vmem:[#allocation8 + $0x8] sm:$0xff] %v1416_v27  ;;  %v1339_v34 = vmax.f32 %v1693_v48, -128.0  ;;  %v1534_v22 = vadd.f32 %v1693_v48, %v1533_v5  ;;  %v841_v57 = vadd.s32 %v2782_v1, %v838_v58  ;;  %v855_v28 = vadd.s32 %v2784_v44, %v852_v59 }
 0x2f2   :  { %v1417_v37 = vpack.c.b16 %v1992_v49, %v1990_v30  ;;  %v1995_v24 = vtrunc.f32 %v1366_v4  ;;  %vm1023_vm5 = vcmp.eq.s32.totalorder %v2964_v19, %v813_v2  ;;  %vm1024_vm6 = vcmp.eq.s32.totalorder %v2964_v19, %v827_v61 }
 0x2f3   :  { %v1367_v17 = vmin.f32 %v1339_v34, 127.0  ;;  %v1694_v45 = vsel %vm1023_vm5, 1.0, %v2201_v29  ;;  %1950 = vmatmul.mubr.msk.f32.gmra.mxu1 %vm1023_vm5, %v2202_v38  ;;  %v1695_v54 = vsel %vm1024_vm6, 1.0, %v2201_v29  ;;  %v866_v43 = vcvt.f32.s32 %v865_v39  ;;  %v893_v32 = vpop.xlane.xlu1 %892  ;;  %v907_v62 = vpop.xlane.xlu0 %906 }
 0x2f4   :  { %v1996_v10 = vcvt.f32.s32 %v1995_v24  ;;  %v1340_v1 = vmax.f32 %v1694_v45, -128.0  ;;  %v1535_v25 = vadd.f32 %v1694_v45, %v1534_v22  ;;  %1952 = vmatprep.mubr.msk.f32.mxu1 %vm1024_vm6, %v2202_v38  ;;  %v1341_v44 = vmax.f32 %v1695_v54, -128.0 }
 0x2f5   :  { %v1997_v40 = vtrunc.f32 %v1367_v17  ;;  %v869_v47 = vadd.s32 %v2787_v26, %v866_v43  ;;  %v880_v15 = vcvt.f32.s32 %v879_v42  ;;  %vm1025_vm7 = vcmp.eq.s32.totalorder %v2964_v19, %v841_v57 }
 0x2f6   :  { %v1418_v6 = vpack.c.b16 %v1996_v10, %v1994_v55  ;;  %v1368_v60 = vmin.f32 %v1340_v1, 127.0  ;;  %v1369_v0 = vmin.f32 %v1341_v44, 127.0  ;;  %v1536_v51 = vadd.f32 %v1695_v54, %v1535_v25 }
 0x2f7   :  { %v1998_v21 = vcvt.f32.s32 %v1997_v40  ;;  %v883_v18 = vadd.s32 %v2789_v36, %v880_v15  ;;  %v1696_v31 = vsel %vm1025_vm7, 1.0, %v2201_v29  ;;  %1953 = vmatmul.mubr.msk.f32.gmra.mxu1 %vm1025_vm7, %v2202_v38  ;;  %vm1026_vm8 = vcmp.eq.s32.totalorder %v2964_v19, %v855_v28  ;;  %v921_v46 = vpop.xlane.xlu1 %920  ;;  %v935_v30 = vpop.xlane.xlu0 %934 }
 0x2f8   :  { %v1419_v63 = vpack.c.b8 %v1418_v6, %v1417_v37  ;;  %v1999_v3 = vtrunc.f32 %v1368_v60  ;;  %v2001_v26 = vtrunc.f32 %v1369_v0  ;;  %v1342_v53 = vmax.f32 %v1696_v31, -128.0  ;;  %1955 = vmatprep.mubr.msk.f32.mxu1 %vm1026_vm8, %v2202_v38 }
 0x2f9   :  { %v1537_v20 = vadd.f32 %v1696_v31, %v1536_v51  ;;  %v1697_v16 = vsel %vm1026_vm8, 1.0, %v2201_v29  ;;  %v894_v2 = vcvt.f32.s32 %v893_v32  ;;  %v908_v23 = vcvt.f32.s32 %v907_v62 }
 0x2fa   :  { %1434 = vst [vmem:[#allocation8 + $0x10] sm:$0xff] %v1419_v63  ;;  %v2000_v36 = vcvt.f32.s32 %v1999_v3  ;;  %v2002_v61 = vcvt.f32.s32 %v2001_v26  ;;  %v1370_v8 = vmin.f32 %v1342_v53, 127.0  ;;  %v1343_v56 = vmax.f32 %v1697_v16, -128.0 }
 0x2fb   :  { %v1538_v12 = vadd.f32 %v1697_v16, %v1537_v20  ;;  %v897_v35 = vadd.s32 %v2793_v50, %v894_v2  ;;  %v911_v5 = vadd.s32 %v2796_v41, %v908_v23  ;;  %vm1027_vm9 = vcmp.eq.s32.totalorder %v2964_v19, %v869_v47  ;;  %v949_v42 = vpop.xlane.xlu1 %948  ;;  %v963_v24 = vpop.xlane.xlu0 %962 }
 0x2fc   :  { %v1420_v27 = vpack.c.b16 %v2000_v36, %v1998_v21  ;;  %v2003_v58 = vtrunc.f32 %v1370_v8  ;;  %v1371_v59 = vmin.f32 %v1343_v56, 127.0  ;;  %v1698_v39 = vsel %vm1027_vm9, 1.0, %v2201_v29  ;;  %1956 = vmatmul.mubr.msk.f32.gmra.mxu1 %vm1027_vm9, %v2202_v38 }
 0x2fd   :  { %v1344_v49 = vmax.f32 %v1698_v39, -128.0  ;;  %v1539_v55 = vadd.f32 %v1698_v39, %v1538_v12  ;;  %vm1028_vm10 = vcmp.eq.s32.totalorder %v2964_v19, %v883_v18  ;;  %v922_v4 = vcvt.f32.s32 %v921_v46 }
 0x2fe   :  { %v2004_v48 = vcvt.f32.s32 %v2003_v58  ;;  %v2005_v34 = vtrunc.f32 %v1371_v59  ;;  %v1699_v50 = vsel %vm1028_vm10, 1.0, %v2201_v29  ;;  %1958 = vmatprep.mubr.msk.f32.mxu1 %vm1028_vm10, %v2202_v38  ;;  %v936_v41 = vcvt.f32.s32 %v935_v30 }
 0x2ff   :  { %v1372_v22 = vmin.f32 %v1344_v49, 127.0  ;;  %v1345_v57 = vmax.f32 %v1699_v50, -128.0  ;;  %v1540_v28 = vadd.f32 %v1699_v50, %v1539_v55  ;;  %v925_v37 = vadd.s32 %v2802_v11, %v922_v4  ;;  %v977_v44 = vpop.xlane.xlu1 %976  ;;  %v991_v46 = vpop.xlane.xlu0 %990 }
 0x300   :  { %v1421_v17 = vpack.c.b16 %v2004_v48, %v2002_v61  ;;  %v2006_v45 = vcvt.f32.s32 %v2005_v34  ;;  %v939_v54 = vadd.s32 %v2804_v7, %v936_v41  ;;  %vm1029_vm11 = vcmp.eq.s32.totalorder %v2964_v19, %v897_v35 }
 0x301   :  { %v2007_v43 = vtrunc.f32 %v1372_v22  ;;  %v1373_v32 = vmin.f32 %v1345_v57, 127.0  ;;  %v1700_v62 = vsel %vm1029_vm11, 1.0, %v2201_v29  ;;  %1959 = vmatmul.mubr.msk.f32.gmra.mxu1 %vm1029_vm11, %v2202_v38  ;;  %vm1030_vm12 = vcmp.eq.s32.totalorder %v2964_v19, %v911_v5 }
 0x302   :  { %v1422_v10 = vpack.c.b8 %v1421_v17, %v1420_v27  ;;  %v1346_v1 = vmax.f32 %v1700_v62, -128.0  ;;  %v1541_v25 = vadd.f32 %v1700_v62, %v1540_v28  ;;  %v1701_v11 = vsel %vm1030_vm12, 1.0, %v2201_v29  ;;  %1961 = vmatprep.mubr.msk.f32.mxu1 %vm1030_vm12, %v2202_v38 }
 0x303   :  { %v2008_v40 = vcvt.f32.s32 %v2007_v43  ;;  %v2009_v7 = vtrunc.f32 %v1373_v32  ;;  %v1347_v47 = vmax.f32 %v1701_v11, -128.0  ;;  %v950_v15 = vcvt.f32.s32 %v949_v42  ;;  %v1005_v61 = vpop.xlane.xlu1 %1004 }
 0x304   :  { %1435 = vst [vmem:[#allocation8 + $0x18] sm:$0xff] %v1422_v10  ;;  %v1374_v6 = vmin.f32 %v1346_v1, 127.0  ;;  %v1542_v60 = vadd.f32 %v1701_v11, %v1541_v25  ;;  %v964_v0 = vcvt.f32.s32 %v963_v24  ;;  %vm1031_vm13 = vcmp.eq.s32.totalorder %v2964_v19, %v925_v37 }
 0x305   :  { %v1423_v51 = vpack.c.b16 %v2008_v40, %v2006_v45  ;;  %v2010_v21 = vcvt.f32.s32 %v2009_v7  ;;  %v1375_v18 = vmin.f32 %v1347_v47, 127.0  ;;  %v953_v31 = vadd.s32 %v2806_v52, %v950_v15  ;;  %1962 = vmatmul.mubr.msk.f32.gmra.mxu1 %vm1031_vm13, %v2202_v38 }
 0x306   :  { %v2011_v63 = vtrunc.f32 %v1374_v6  ;;  %v967_v3 = vadd.s32 %v2811_v33, %v964_v0  ;;  %v1702_v26 = vsel %vm1031_vm13, 1.0, %v2201_v29  ;;  %vm1032_vm14 = vcmp.eq.s32.totalorder %v2964_v19, %v939_v54 }
 0x307   :  { %v2013_v53 = vtrunc.f32 %v1375_v18  ;;  %v1348_v20 = vmax.f32 %v1702_v26, -128.0  ;;  %v1543_v16 = vadd.f32 %v1702_v26, %v1542_v60  ;;  %v1703_v2 = vsel %vm1032_vm14, 1.0, %v2201_v29  ;;  %1964 = vmatprep.mubr.msk.f32.mxu1 %vm1032_vm14, %v2202_v38 }
 0x308   :  { %v2012_v23 = vcvt.f32.s32 %v2011_v63  ;;  %v1349_v30 = vmax.f32 %v1703_v2, -128.0  ;;  %v978_v52 = vcvt.f32.s32 %v977_v44  ;;  %v992_v36 = vcvt.f32.s32 %v991_v46 }
 0x309   :  { %v2014_v8 = vcvt.f32.s32 %v2013_v53  ;;  %v1376_v56 = vmin.f32 %v1348_v20, 127.0  ;;  %v1544_v12 = vadd.f32 %v1703_v2, %v1543_v16  ;;  %vm1033_vm15 = vcmp.eq.s32.totalorder %v2964_v19, %v953_v31 }
 0x30a   :  { %v1424_v33 = vpack.c.b16 %v2012_v23, %v2010_v21  ;;  %v1377_v35 = vmin.f32 %v1349_v30, 127.0  ;;  %v981_v5 = vadd.s32 %v2813_v9, %v978_v52  ;;  %v995_v27 = vadd.s32 %v2820_v14, %v992_v36  ;;  %1965 = vmatmul.mubr.msk.f32.gmra.mxu1 %vm1033_vm15, %v2202_v38 }
 0x30b   :  { %v2015_v58 = vtrunc.f32 %v1376_v56  ;;  %v1704_v59 = vsel %vm1033_vm15, 1.0, %v2201_v29  ;;  %vm1034_vm0 = vcmp.eq.s32.totalorder %v2964_v19, %v967_v3  ;;  %v1006_v39 = vcvt.f32.s32 %v1005_v61 }
 0x30c   :  { %v1425_v42 = vpack.c.b8 %v1424_v33, %v1423_v51  ;;  %v2017_v49 = vtrunc.f32 %v1377_v35  ;;  %v1350_v55 = vmax.f32 %v1704_v59, -128.0  ;;  %v1545_v4 = vadd.f32 %v1704_v59, %v1544_v12  ;;  %1967 = vmatprep.mubr.msk.f32.mxu1 %vm1034_vm0, %v2202_v38 }
 0x30d   :  { %v2016_v48 = vcvt.f32.s32 %v2015_v58  ;;  %v1705_v34 = vsel %vm1034_vm0, 1.0, %v2201_v29  ;;  %v1009_v9 = vadd.s32 %v2822_v13, %v1006_v39  ;;  %vm1035_vm1 = vcmp.eq.s32.totalorder %v2964_v19, %v981_v5 }
 0x30e   :  { %1436 = vst [vmem:[#allocation8 + $0x20] sm:$0xff] %v1425_v42  ;;  %v1378_v14 = vmin.f32 %v1350_v55, 127.0  ;;  %v1351_v50 = vmax.f32 %v1705_v34, -128.0  ;;  %v1546_v41 = vadd.f32 %v1705_v34, %v1545_v4  ;;  %1968 = vmatmul.mubr.msk.f32.gmra.mxu1 %vm1035_vm1, %v2202_v38  ;;  %v1706_v57 = vsel %vm1035_vm1, 1.0, %v2201_v29 }
 0x30f   :  { %v1426_v22 = vpack.c.b16 %v2016_v48, %v2014_v8  ;;  %vm1036_vm2 = vcmp.eq.s32.totalorder %v2964_v19, %v995_v27  ;;  %vm1037_vm3 = vcmp.eq.s32.totalorder %v2964_v19, %v1009_v9  ;;  %v1352_v24 = vmax.f32 %v1706_v57, -128.0 }
 0x310   :  { %v2019_v28 = vtrunc.f32 %v1378_v14  ;;  %v1379_v37 = vmin.f32 %v1351_v50, 127.0  ;;  %v1464_v17 = vmul.f32 0.0, %v1706_v57  ;;  %1970 = vmatprep.mubr.msk.f32.mxu1 %vm1036_vm2, %v2202_v38  ;;  %v2018_v13 = vcvt.f32.s32 %v2017_v49 }
 0x311   :  { %v1707_v45 = vsel %vm1036_vm2, 1.0, %v2201_v29  ;;  %v1708_v54 = vsel %vm1037_vm3, 1.0, %v2201_v29  ;;  %v1380_v62 = vmin.f32 %v1352_v24, 127.0 }
 0x312   :  { %v2020_v43 = vcvt.f32.s32 %v2019_v28  ;;  %v2021_v32 = vtrunc.f32 %v1379_v37  ;;  %v1547_v10 = vadd.f32 %v1546_v41, %v1464_v17  ;;  %1971 = vmatmul.mubr.msk.f32.gmra.mxu1 %vm1037_vm3, %v2202_v38  ;;  %v1353_v1 = vmax.f32 %v1707_v45, -128.0 }
 0x313   :  { %v1465_v25 = vmul.f32 0.0, %v1707_v45  ;;  %v1354_v19 = vmax.f32 %v1708_v54, -128.0  ;;  %v1466_v11 = vmul.f32 0.0, %v1708_v54  ;;  %v2023_v40 = vtrunc.f32 %v1380_v62 }
 0x314   :  { %v1427_v44 = vpack.c.b16 %v2020_v43, %v2018_v13  ;;  %v1381_v7 = vmin.f32 %v1353_v1, 127.0  ;;  %v2022_v60 = vcvt.f32.s32 %v2021_v32 }
 0x315   :  { %v1548_v47 = vadd.f32 %v1547_v10, %v1465_v25  ;;  %v1382_v15 = vmin.f32 %v1354_v19, 127.0  ;;  %v2024_v0 = vcvt.f32.s32 %v2023_v40 }
 0x316   :  { %v1428_v6 = vpack.c.b8 %v1427_v44, %v1426_v22  ;;  %v2025_v51 = vtrunc.f32 %v1381_v7 }
 0x317   :  { %v2027_v29 = vtrunc.f32 %v1382_v15  ;;  %v1549_v21 = vadd.f32 %v1548_v47, %v1466_v11  ;;  %v1429_v18 = vpack.c.b16 %v2024_v0, %v2022_v60 }
 0x318   :  { %1437 = vst [vmem:[#allocation8 + $0x28] sm:$0xff] %v1428_v6  ;;  %v2026_v31 = vcvt.f32.s32 %v2025_v51 }
 0x319   :  { %v2028_v46 = vcvt.f32.s32 %v2027_v29  ;;  %v1550_v38 = vrot.slane %v1549_v21, 4 }
 0x31b   :  { %v1430_v63 = vpack.c.b16 %v2028_v46, %v2026_v31  ;;  %v1551_v3 = vadd.f32 %v1550_v38, %v1549_v21 }
 0x31d   :  { %v1431_v26 = vpack.c.b8 %v1430_v63, %v1429_v18  ;;  %v1552_v53 = vrot.slane %v1551_v3, 2 }
 0x31f   :  { %1438 = vst [vmem:[#allocation8 + $0x30] sm:$0xff] %v1431_v26  ;;  %v1553_v20 = vadd.f32 %v1552_v53, %v1551_v3 }
 0x321   :  { %v1554_v16 = vrot.slane %v1553_v20, 1 }
 0x323   :  { %v1555_v2 = vadd.f32 %v1554_v16, %v1553_v20 }
 0x325   :  { %1556 = vst [vmem:[#allocation10] sm:$0x1] %v1555_v2 }
 0x326   :  { %2118 = shalt.err (!%p2115_p0)
}
 0x327   :  { %1642 = dma.vmem_to_hbm [thread:$0]  %s1637_s9, 896, %s2952_s4, [#allocation9], %s2198_s24, %s2198_s24, %s2199_s25  }
 0x328   :  { %s2204_s13 = smov [#allocation10]  }
 0x329   :  { %s1649_s14 = sshll.u32 %s2204_s13, 4  ;;  %s1650_s14 = int_to_ptr.vmem [resolvable:$true] %s1649_s14 }
 0x32a   :  { %s2127_s15 = scalar_lea.vmem %s1650_s14, 16  ;;  %s2131_s16 = scalar_lea.vmem %s1650_s14, 32 }
 0x32b   :  { %p2128_p1 = scmp.ne.s32.totalorder %s1650_s14, %s2127_s15  ;;  %p2132_p2 = scmp.lt.s32.totalorder %s1650_s14, %s1650_s14 }
 0x32c   :  { %p2133_p3 = scmp.lt.s32.totalorder %s2131_s16, %s2127_s15 }
 0x32e   :  { %p2134_p4 = por %p2133_p3, %p2132_p2 }
 0x330   :  { %p2135_p5 = pnand %p2134_p4, %p2128_p1 }
 0x332   :  { %2138 = shalt.err (!%p2135_p5)
}
 0x333   :  { %1652 = dma.vmem_to_hbm [thread:$0]  %s1650_s14, 16, %s2953_s5, [#allocation9]   ;;  %v2039_v52 = vld [vmem:[#allocation2] sm:$0xff]  ;;  %v2040_v61 = vld [vmem:[#allocation2 + $0x8] sm:$0xff]  ;;  %v2041_v5 = vld [vmem:[#allocation2 + $0x18] sm:$0xff] }
 0x334   :  { %v2042_v58 = vld [vmem:[#allocation2 + $0x10] sm:$0xff]  ;;  %v2043_v34 = vld [vmem:[#allocation2 + $0x28] sm:$0xff]  ;;  %v2044_v14 = vld [vmem:[#allocation2 + $0x20] sm:$0xff]  ;;  %s2205_s4 = smov [#allocation7]  }
 0x335   :  { %v2045_v17 = vld [vmem:[#allocation2 + $0x38] sm:$0xff]  ;;  %v2046_v45 = vld [vmem:[#allocation2 + $0x30] sm:$0xff]  ;;  %v2047_v19 = vld [vmem:[#allocation2 + $0x48] sm:$0xff]  ;;  %s1624_s5 = sshll.u32 %s2205_s4, 4  ;;  %s1625_s5 = int_to_ptr.vmem [resolvable:$true] %s1624_s5 }
 0x336   :  { %v2048_v44 = vld [vmem:[#allocation2 + $0x40] sm:$0xff]  ;;  %v2049_v51 = vld [vmem:[#allocation2 + $0x58] sm:$0xff]  ;;  %v2050_v21 = vld [vmem:[#allocation2 + $0x50] sm:$0xff]  ;;  %s2147_s19 = scalar_lea.vmem %s1625_s5, 3584  ;;  %p2152_p7 = scmp.lt.s32.totalorder %s1625_s5, %s1625_s5 }
 0x337   :  { %v2051_v53 = vld [vmem:[#allocation2 + $0x68] sm:$0xff]  ;;  %v2052_v16 = vld [vmem:[#allocation2 + $0x60] sm:$0xff]  ;;  %p2148_p6 = scmp.ne.s32.totalorder %s1625_s5, %s2147_s19  ;;  %p2153_p8 = scmp.lt.s32.totalorder %s2147_s19, %s2147_s19 }
 0x339   :  { %p2154_p9 = por %p2153_p8, %p2152_p7 }
 0x33b   :  { %p2155_p10 = pnand %p2154_p9, %p2148_p6 }
 0x395   :  { %v1933_v23 = vpop.f32.mrf.mxu1 }
 0x396   :  { %1300 = vst [vmem:[#allocation7 + $0x8] sm:$0xff] %v1933_v23  ;;  %v1468_v8 = vsub.f32 %v1933_v23, %v2040_v61 }
 0x397   :  { %v1160_v30 = vpop.f32.mrf.mxu1 }
 0x398   :  { %1299 = vst [vmem:[#allocation7] sm:$0xff] %v1160_v30  ;;  %v1467_v36 = vsub.f32 %v1160_v30, %v2039_v52  ;;  %v1558_v35 = vmul.f32 %v1468_v8, %v1468_v8 }
 0x39a   :  { %v1936_v56 = vpop.f32.mrf.mxu1  ;;  %v1557_v12 = vmul.f32 %v1467_v36, %v1467_v36 }
 0x39b   :  { %1302 = vst [vmem:[#allocation7 + $0x18] sm:$0xff] %v1936_v56  ;;  %v1470_v27 = vsub.f32 %v1936_v56, %v2041_v5  ;;  %v2053_v56 = vld [vmem:[#allocation2 + $0x78] sm:$0xff] }
 0x39c   :  { %v1170_v33 = vpop.f32.mrf.mxu1  ;;  %v1585_v42 = vadd.f32 %v1558_v35, %v1557_v12 }
 0x39d   :  { %1301 = vst [vmem:[#allocation7 + $0x10] sm:$0xff] %v1170_v33  ;;  %v1469_v59 = vsub.f32 %v1170_v33, %v2042_v58  ;;  %v1560_v4 = vmul.f32 %v1470_v27, %v1470_v27  ;;  %v2054_v33 = vld [vmem:[#allocation2 + $0x70] sm:$0xff] }
 0x39e   :  { %v1939_v39 = vpop.f32.mrf.mxu1 }
 0x39f   :  { %v1559_v49 = vmul.f32 %v1469_v59, %v1469_v59  ;;  %1304 = vst [vmem:[#allocation7 + $0x28] sm:$0xff] %v1939_v39  ;;  %v1472_v9 = vsub.f32 %v1939_v39, %v2043_v34 }
 0x3a0   :  { %v1180_v55 = vpop.f32.mrf.mxu1 }
 0x3a1   :  { %v1586_v48 = vadd.f32 %v1585_v42, %v1559_v49  ;;  %1303 = vst [vmem:[#allocation7 + $0x20] sm:$0xff] %v1180_v55  ;;  %v1471_v50 = vsub.f32 %v1180_v55, %v2044_v14  ;;  %v1562_v28 = vmul.f32 %v1472_v9, %v1472_v9  ;;  %v2055_v49 = vld [vmem:[#allocation2 + $0x88] sm:$0xff] }
 0x3a3   :  { %v1561_v41 = vmul.f32 %v1471_v50, %v1471_v50  ;;  %v1587_v22 = vadd.f32 %v1586_v48, %v1560_v4  ;;  %v1942_v57 = vpop.f32.mrf.mxu1  ;;  %v2056_v4 = vld [vmem:[#allocation2 + $0x80] sm:$0xff] }
 0x3a4   :  { %1306 = vst [vmem:[#allocation7 + $0x38] sm:$0xff] %v1942_v57  ;;  %v1474_v13 = vsub.f32 %v1942_v57, %v2045_v17  ;;  %v2057_v57 = vld [vmem:[#allocation2 + $0x98] sm:$0xff] }
 0x3a5   :  { %v1588_v37 = vadd.f32 %v1587_v22, %v1561_v41  ;;  %v1190_v24 = vpop.f32.mrf.mxu1 }
 0x3a6   :  { %1305 = vst [vmem:[#allocation7 + $0x30] sm:$0xff] %v1190_v24  ;;  %v1473_v54 = vsub.f32 %v1190_v24, %v2046_v45  ;;  %v1564_v10 = vmul.f32 %v1474_v13, %v1474_v13 }
 0x3a7   :  { %v1589_v43 = vadd.f32 %v1588_v37, %v1562_v28  ;;  %v2058_v37 = vld [vmem:[#allocation2 + $0x90] sm:$0xff] }
 0x3a8   :  { %v1563_v32 = vmul.f32 %v1473_v54, %v1473_v54 }
 0x3a9   :  { %v1945_v62 = vpop.f32.mrf.mxu1 }
 0x3aa   :  { %v1590_v1 = vadd.f32 %v1589_v43, %v1563_v32  ;;  %1308 = vst [vmem:[#allocation7 + $0x48] sm:$0xff] %v1945_v62  ;;  %v1476_v11 = vsub.f32 %v1945_v62, %v2047_v19  ;;  %v2059_v62 = vld [vmem:[#allocation2 + $0xa8] sm:$0xff] }
 0x3ab   :  { %v1200_v25 = vpop.f32.mrf.mxu1 }
 0x3ac   :  { %1307 = vst [vmem:[#allocation7 + $0x40] sm:$0xff] %v1200_v25  ;;  %v1475_v40 = vsub.f32 %v1200_v25, %v2048_v44  ;;  %v1591_v7 = vadd.f32 %v1590_v1, %v1564_v10  ;;  %v1566_v60 = vmul.f32 %v1476_v11, %v1476_v11  ;;  %v2060_v1 = vld [vmem:[#allocation2 + $0xa0] sm:$0xff] }
 0x3ad   :  { %v1948_v47 = vpop.f32.mrf.mxu1 }
 0x3ae   :  { %v1565_v15 = vmul.f32 %v1475_v40, %v1475_v40  ;;  %1310 = vst [vmem:[#allocation7 + $0x58] sm:$0xff] %v1948_v47  ;;  %v1478_v29 = vsub.f32 %v1948_v47, %v2049_v51 }
 0x3af   :  { %v1210_v6 = vpop.f32.mrf.mxu1 }
 0x3b0   :  { %v1592_v0 = vadd.f32 %v1591_v7, %v1565_v15  ;;  %1309 = vst [vmem:[#allocation7 + $0x50] sm:$0xff] %v1210_v6  ;;  %v1477_v18 = vsub.f32 %v1210_v6, %v2050_v21  ;;  %v1568_v63 = vmul.f32 %v1478_v29, %v1478_v29  ;;  %v2061_v15 = vld [vmem:[#allocation2 + $0xb8] sm:$0xff] }
 0x3b2   :  { %v1567_v31 = vmul.f32 %v1477_v18, %v1477_v18  ;;  %v1593_v46 = vadd.f32 %v1592_v0, %v1566_v60  ;;  %v2062_v60 = vld [vmem:[#allocation2 + $0xb0] sm:$0xff]  ;;  %v2063_v18 = vld [vmem:[#allocation2 + $0xc8] sm:$0xff] }
 0x3b3   :  { %v1951_v38 = vpop.f32.mrf.mxu1 }
 0x3b4   :  { %v1594_v3 = vadd.f32 %v1593_v46, %v1567_v31  ;;  %1312 = vst [vmem:[#allocation7 + $0x68] sm:$0xff] %v1951_v38  ;;  %v1480_v20 = vsub.f32 %v1951_v38, %v2051_v53 }
 0x3b5   :  { %v1220_v26 = vpop.f32.mrf.mxu1 }
 0x3b6   :  { %1311 = vst [vmem:[#allocation7 + $0x60] sm:$0xff] %v1220_v26  ;;  %v1479_v2 = vsub.f32 %v1220_v26, %v2052_v16  ;;  %v1595_v23 = vadd.f32 %v1594_v3, %v1568_v63  ;;  %v1570_v61 = vmul.f32 %v1480_v20, %v1480_v20  ;;  %v2064_v3 = vld [vmem:[#allocation2 + $0xc0] sm:$0xff] }
 0x3b7   :  { %v1954_v30 = vpop.f32.mrf.mxu1 }
 0x3b8   :  { %v1569_v52 = vmul.f32 %v1479_v2, %v1479_v2  ;;  %1314 = vst [vmem:[#allocation7 + $0x78] sm:$0xff] %v1954_v30  ;;  %v1482_v12 = vsub.f32 %v1954_v30, %v2053_v56 }
 0x3b9   :  { %v1230_v36 = vpop.f32.mrf.mxu1 }
 0x3ba   :  { %v1596_v8 = vadd.f32 %v1595_v23, %v1569_v52  ;;  %1313 = vst [vmem:[#allocation7 + $0x70] sm:$0xff] %v1230_v36  ;;  %v1481_v35 = vsub.f32 %v1230_v36, %v2054_v33  ;;  %v1572_v59 = vmul.f32 %v1482_v12, %v1482_v12  ;;  %v2065_v23 = vld [vmem:[#allocation2 + $0xd8] sm:$0xff] }
 0x3bc   :  { %v1571_v5 = vmul.f32 %v1481_v35, %v1481_v35  ;;  %v1597_v27 = vadd.f32 %v1596_v8, %v1570_v61  ;;  %v1957_v58 = vpop.f32.mrf.mxu1  ;;  %v2066_v61 = vld [vmem:[#allocation2 + $0xd0] sm:$0xff] }
 0x3bd   :  { %1316 = vst [vmem:[#allocation7 + $0x88] sm:$0xff] %v1957_v58  ;;  %v1484_v55 = vsub.f32 %v1957_v58, %v2055_v49 }
 0x3be   :  { %v1598_v39 = vadd.f32 %v1597_v27, %v1571_v5  ;;  %v1240_v42 = vpop.f32.mrf.mxu1 }
 0x3bf   :  { %1315 = vst [vmem:[#allocation7 + $0x80] sm:$0xff] %v1240_v42  ;;  %v1483_v48 = vsub.f32 %v1240_v42, %v2056_v4  ;;  %v1574_v50 = vmul.f32 %v1484_v55, %v1484_v55 }
 0x3c0   :  { %v1599_v34 = vadd.f32 %v1598_v39, %v1572_v59 }
 0x3c1   :  { %v1573_v9 = vmul.f32 %v1483_v48, %v1483_v48  ;;  %v1960_v14 = vpop.f32.mrf.mxu1 }
 0x3c2   :  { %1318 = vst [vmem:[#allocation7 + $0x98] sm:$0xff] %v1960_v14  ;;  %v1486_v28 = vsub.f32 %v1960_v14, %v2057_v57 }
 0x3c3   :  { %v1600_v41 = vadd.f32 %v1599_v34, %v1573_v9  ;;  %v1250_v22 = vpop.f32.mrf.mxu1 }
 0x3c4   :  { %1317 = vst [vmem:[#allocation7 + $0x90] sm:$0xff] %v1250_v22  ;;  %v1485_v24 = vsub.f32 %v1250_v22, %v2058_v37  ;;  %v1576_v43 = vmul.f32 %v1486_v28, %v1486_v28 }
 0x3c5   :  { %v1601_v17 = vadd.f32 %v1600_v41, %v1574_v50  ;;  %v1963_v13 = vpop.f32.mrf.mxu1 }
 0x3c6   :  { %v1575_v45 = vmul.f32 %v1485_v24, %v1485_v24  ;;  %1320 = vst [vmem:[#allocation7 + $0xa8] sm:$0xff] %v1963_v13  ;;  %v1488_v10 = vsub.f32 %v1963_v13, %v2059_v62 }
 0x3c7   :  { %v1260_v54 = vpop.f32.mrf.mxu1 }
 0x3c8   :  { %v1602_v32 = vadd.f32 %v1601_v17, %v1575_v45  ;;  %1319 = vst [vmem:[#allocation7 + $0xa0] sm:$0xff] %v1260_v54  ;;  %v1487_v25 = vsub.f32 %v1260_v54, %v2060_v1  ;;  %v1578_v40 = vmul.f32 %v1488_v10, %v1488_v10 }
 0x3ca   :  { %v1577_v19 = vmul.f32 %v1487_v25, %v1487_v25  ;;  %v1603_v11 = vadd.f32 %v1602_v32, %v1576_v43  ;;  %v1966_v44 = vpop.f32.mrf.mxu1 }
 0x3cb   :  { %1322 = vst [vmem:[#allocation7 + $0xb8] sm:$0xff] %v1966_v44  ;;  %v1490_v6 = vsub.f32 %v1966_v44, %v2061_v15 }
 0x3cc   :  { %v1604_v7 = vadd.f32 %v1603_v11, %v1577_v19  ;;  %v1270_v47 = vpop.f32.mrf.mxu1 }
 0x3cd   :  { %1321 = vst [vmem:[#allocation7 + $0xb0] sm:$0xff] %v1270_v47  ;;  %v1489_v0 = vsub.f32 %v1270_v47, %v2062_v60  ;;  %v1580_v38 = vmul.f32 %v1490_v6, %v1490_v6 }
 0x3ce   :  { %v1605_v51 = vadd.f32 %v1604_v7, %v1578_v40  ;;  %v1969_v29 = vpop.f32.mrf.mxu1 }
 0x3cf   :  { %v1579_v21 = vmul.f32 %v1489_v0, %v1489_v0  ;;  %1324 = vst [vmem:[#allocation7 + $0xc8] sm:$0xff] %v1969_v29  ;;  %v1492_v31 = vsub.f32 %v1969_v29, %v2063_v18 }
 0x3d0   :  { %v1280_v46 = vpop.f32.mrf.mxu1 }
 0x3d1   :  { %v1606_v63 = vadd.f32 %v1605_v51, %v1579_v21  ;;  %1323 = vst [vmem:[#allocation7 + $0xc0] sm:$0xff] %v1280_v46  ;;  %v1491_v26 = vsub.f32 %v1280_v46, %v2064_v3  ;;  %v1520_v20 = vmul.f32 0.0, %v1492_v31 }
 0x3d2   :  { %v1972_v53 = vpop.f32.mrf.mxu1 }
 0x3d3   :  { %v1581_v16 = vmul.f32 %v1491_v26, %v1491_v26  ;;  %v1607_v2 = vadd.f32 %v1606_v63, %v1580_v38  ;;  %1326 = vst [vmem:[#allocation7 + $0xd8] sm:$0xff] %v1972_v53  ;;  %v1494_v30 = vsub.f32 %v1972_v53, %v2065_v23 }
 0x3d4   :  { %v1290_v52 = vpop.f32.mrf.mxu1 }
 0x3d5   :  { %v1608_v36 = vadd.f32 %v1607_v2, %v1581_v16  ;;  %1325 = vst [vmem:[#allocation7 + $0xd0] sm:$0xff] %v1290_v52  ;;  %v1493_v8 = vsub.f32 %v1290_v52, %v2066_v61 }
 0x3d6   :  { %2158 = shalt.err (!%p2155_p10)
}
 0x3d7   :  { %1630 = dma.vmem_to_hbm [thread:$0]  %s1625_s5, 3584, %s2951_s3, [#allocation4], %s2198_s24, %s2198_s24, %s2199_s25   ;;  %v1582_v56 = vmul.f32 %v1520_v20, %v1520_v20  ;;  %v1522_v12 = vmul.f32 0.0, %v1494_v30  ;;  %v1521_v33 = vmul.f32 0.0, %v1493_v8 }
 0x3d8   :  { %s2206_s22 = smov [#allocation11]  }
 0x3d9   :  { %v1583_v35 = vmul.f32 %v1521_v33, %v1521_v33  ;;  %v1609_v5 = vadd.f32 %v1608_v36, %v1582_v56  ;;  %v1584_v27 = vmul.f32 %v1522_v12, %v1522_v12  ;;  %s1659_s23 = sshll.u32 %s2206_s22, 4  ;;  %s1660_s23 = int_to_ptr.vmem [resolvable:$true] %s1659_s23 }
 0x3da   :  { %s2167_s26 = scalar_lea.vmem %s1660_s23, 16  ;;  %s2171_s3 = scalar_lea.vmem %s1660_s23, 32 }
 0x3db   :  { %v1610_v58 = vadd.f32 %v1609_v5, %v1583_v35  ;;  %p2168_p11 = scmp.ne.s32.totalorder %s1660_s23, %s2167_s26  ;;  %p2172_p12 = scmp.lt.s32.totalorder %s1660_s23, %s1660_s23 }
 0x3dc   :  { %p2173_p13 = scmp.lt.s32.totalorder %s2171_s3, %s2167_s26 }
 0x3dd   :  { %v1611_v59 = vadd.f32 %v1610_v58, %v1584_v27 }
 0x3de   :  { %p2174_p0 = por %p2173_p13, %p2172_p12 }
 0x3df   :  { %v1612_v39 = vrot.slane %v1611_v59, 4 }
 0x3e0   :  { %p2175_p1 = pnand %p2174_p0, %p2168_p11 }
 0x3e1   :  { %v1613_v42 = vadd.f32 %v1612_v39, %v1611_v59 }
 0x3e3   :  { %v1614_v49 = vrot.slane %v1613_v42, 2 }
 0x3e5   :  { %v1615_v55 = vadd.f32 %v1614_v49, %v1613_v42 }
 0x3e7   :  { %v1616_v4 = vrot.slane %v1615_v55, 1 }
 0x3e9   :  { %v1617_v48 = vadd.f32 %v1616_v4, %v1615_v55 }
 0x3eb   :  { %1618 = vst [vmem:[#allocation11] sm:$0x1] %v1617_v48 }
 0x3ec   :  { %2178 = shalt.err (!%p2175_p1)
}
 0x3ed   :  { %1662 = dma.vmem_to_hbm [thread:$0]  %s1660_s23, 16, %s2954_s6, [#allocation12]  }
 0x3ee   :  { %2191 = dma.done.wait [#allocation4], 3584  }
 0x3ef   :  { %2192 = vsyncadd [#allocation4], 4294963712 }
 0x3f0   :  { %2193 = dma.done.wait [#allocation9], 912  }
 0x3f1   :  { %2194 = vsyncadd [#allocation9], 4294966384 }
 0x3f2   :  { %2195 = dma.done.wait [#allocation12], 16  }
 0x3f3   :  { %2196 = vsyncadd [#allocation12], 4294967280 }
 0x3f4   :  { %1675 = vsyncpa [#allocation3], 1 }
 0x3f5   :  { %1676 = vsyncpa [#allocation6], 1 }
 0x3f6   :  { %1677 = vsyncpa [#allocation4], 1 }
 0x3f7   :  { %1678 = vsyncpa [#allocation9], 1 }
 0x3f8   :  { %1679 = vsyncpa [#allocation12], 1 }

</bundles_post_ra>
